<compile_context>
chip_gen: v7x
topology: tpu7x:2x2x1
jax: 0.10.0
libtpu: 0.0.40
codegen_flags: <defaults>
</compile_context>

<pallas_src>
import functools
import math

import jax
import jax.numpy as jnp
from jax.experimental import pallas as pl
from jax.experimental.pallas import tpu as pltpu


def _mha_kernel(*refs, n_heads, scale, has_wout):
    if has_wout:
        (xq_ref, xkv_ref, wq_ref, bq_ref, wk_ref, bk_ref,
         wv_ref, bv_ref, wout_ref, bout_ref, o_ref) = refs
    else:
        (xq_ref, xkv_ref, wq_ref, bq_ref, wk_ref, bk_ref,
         wv_ref, bv_ref, o_ref) = refs
        wout_ref = bout_ref = None

    f32 = jnp.float32
    cdt = xq_ref.dtype                 # MXU operand dtype (bf16 in the demo)

    xq = xq_ref[0]                     # (TQ,  d)
    xkv = xkv_ref[0]                   # (Skv, d)

    # QKV projections: lane-dense (tokens, d) @ (d, d) MXU matmuls, f32 accumulation.
    # Bias is added once on the f32 accumulator (biases broadcast (1, d) -> (tokens, d)).
    q = jnp.dot(xq, wq_ref[...], preferred_element_type=f32) + bq_ref[...]
    k = jnp.dot(xkv, wk_ref[...], preferred_element_type=f32) + bk_ref[...]
    v = jnp.dot(xkv, wv_ref[...], preferred_element_type=f32) + bv_ref[...]

    tq, d = q.shape
    dh = d // n_heads

    # Single downcast so the attention matmuls feed the MXU with narrow operands.
    qc = q.astype(cdt)
    kc = k.astype(cdt)
    vc = v.astype(cdt)

    acc = jnp.zeros((tq, d), f32)
    # Static (unrolled) head loop; head slices are static lane/sublane slices.
    for h in range(n_heads):
        lo, hi = h * dh, (h + 1) * dh
        qh = qc[:, lo:hi]                               # (TQ,  dh)
        kh = kc[:, lo:hi]                               # (Skv, dh)
        vh = vc[:, lo:hi]                               # (Skv, dh)

        # scores = qh @ kh^T (contract on dh; no explicit transpose materialized).
        s = jax.lax.dot_general(
            qh, kh, (((1,), (1,)), ((), ())),
            preferred_element_type=f32) * scale         # (TQ, Skv), f32

        # Numerically stable softmax, kept in f32.
        m = jnp.max(s, axis=-1, keepdims=True)
        e = jnp.exp(s - m)
        l = jnp.sum(e, axis=-1, keepdims=True)
        p = e / l
        # TODO(synk): training-mode dropout would mask/scale `p` here.

        oh = jnp.dot(p.astype(cdt), vh, preferred_element_type=f32)   # (TQ, dh)

        if has_wout:
            # Fused output projection, accumulated head-by-head:
            #   out += o_h @ W_out[h*dh:(h+1)*dh, :]
            acc = acc + jnp.dot(oh.astype(cdt), wout_ref[lo:hi, :],
                                preferred_element_type=f32)
        else:
            acc = acc + oh                               # n_heads == 1: dh == d

    if has_wout:
        acc = acc + bout_ref[...]
    o_ref[0] = acc.astype(o_ref.dtype)


def mha_forward(x_q, x_kv, wq, bq, wk, bk, wv, bv, wout=None, bout=None,
                *, n_heads, block_q=256, interpret=False):
    """Eval-mode MultiheadAttention forward.

    x_q: [B, Sq, d], x_kv: [B, Skv, d].
    Weights are pre-transposed to [in_features, out_features] (= PyTorch weight.T);
    biases are [d]. wout/bout must be provided iff n_heads > 1.
    """
    B, Sq, d = x_q.shape
    assert x_kv.shape[0] == B and x_kv.shape[2] == d
    Skv = x_kv.shape[1]
    assert d % n_heads == 0
    has_wout = wout is not None
    assert has_wout == (n_heads > 1)
    dh = d // n_heads
    scale = 1.0 / math.sqrt(dh)

    # Query-token tiling: block_q query rows per grid step (pipelined); weights and
    # x_kv blocks are revisited (constant block index) so they are not re-DMA'd.
    tq = min(block_q, Sq)
    if Sq % tq != 0:
        tq = Sq
    grid = (B, Sq // tq)

    bq2 = bq.reshape(1, d)
    bk2 = bk.reshape(1, d)
    bv2 = bv.reshape(1, d)

    in_specs = [
        pl.BlockSpec((1, tq, d), lambda b, t: (b, t, 0)),    # x_q tile (pipelined)
        pl.BlockSpec((1, Skv, d), lambda b, t: (b, 0, 0)),   # x_kv (all kv tokens)
        pl.BlockSpec((d, d), lambda b, t: (0, 0)),           # W_q  (VMEM-resident)
        pl.BlockSpec((1, d), lambda b, t: (0, 0)),           # b_q
        pl.BlockSpec((d, d), lambda b, t: (0, 0)),           # W_k
        pl.BlockSpec((1, d), lambda b, t: (0, 0)),           # b_k
        pl.BlockSpec((d, d), lambda b, t: (0, 0)),           # W_v
        pl.BlockSpec((1, d), lambda b, t: (0, 0)),           # b_v
    ]
    args = [x_q, x_kv, wq, bq2, wk, bk2, wv, bv2]
    if has_wout:
        bout2 = bout.reshape(1, d)
        in_specs += [
            pl.BlockSpec((d, d), lambda b, t: (0, 0)),       # W_out
            pl.BlockSpec((1, d), lambda b, t: (0, 0)),       # b_out
        ]
        args += [wout, bout2]

    out_specs = pl.BlockSpec((1, tq, d), lambda b, t: (b, t, 0))

    # Explicit VMEM budget: resident weights/biases + double-buffered x_q/x_kv/out
    # tiles, with generous headroom; capped at 64 MiB (v7x physical VMEM).
    itemsize = jnp.dtype(x_q.dtype).itemsize
    n_w = 4 if has_wout else 3
    resident = n_w * (d * d + d) * itemsize
    tiles = 2 * (tq * d + Skv * d + tq * d) * itemsize
    vmem_limit = int(min(max(4 * (resident + tiles) + (8 << 20), 16 << 20), 64 << 20))

    kernel = functools.partial(_mha_kernel, n_heads=n_heads, scale=scale,
                               has_wout=has_wout)

    return pl.pallas_call(
        kernel,
        out_shape=jax.ShapeDtypeStruct((B, Sq, d), x_q.dtype),
        grid_spec=pl.GridSpec(grid=grid, in_specs=in_specs, out_specs=out_specs),
        compiler_params=pltpu.CompilerParams(
            dimension_semantics=("parallel", "parallel"),
            vmem_limit_bytes=vmem_limit),
        interpret=interpret,
    )(*args)


def init_mha_params(key, d, n_heads, dtype=jnp.bfloat16):
    """Weights stored transposed as [in, out]. The PyTorch module zeroes the biases;
    we use small random biases here so the bias-add path is actually exercised."""
    ks = jax.random.split(key, 8)
    bound = 1.0 / math.sqrt(d)

    def w(k):
        return jax.random.uniform(k, (d, d), jnp.float32, -bound, bound).astype(dtype)

    def b(k):
        return (0.1 * jax.random.uniform(k, (d,), jnp.float32, -1.0, 1.0)).astype(dtype)

    wq, wk, wv = w(ks[0]), w(ks[1]), w(ks[2])
    bq, bk, bv = b(ks[3]), b(ks[4]), b(ks[5])
    if n_heads > 1:
        wout, bout = w(ks[6]), b(ks[7])
    else:
        wout, bout = None, None
    return wq, bq, wk, bk, wv, bv, wout, bout


def mha_reference(x_q, x_kv, wq, bq, wk, bk, wv, bv, wout, bout, n_heads):
    """Pure-JAX f32 reference mirroring the PyTorch forward (eval mode)."""
    f32 = jnp.float32
    hp = jax.lax.Precision.HIGHEST
    q = jnp.matmul(x_q.astype(f32), wq.astype(f32), precision=hp) + bq.astype(f32)
    k = jnp.matmul(x_kv.astype(f32), wk.astype(f32), precision=hp) + bk.astype(f32)
    v = jnp.matmul(x_kv.astype(f32), wv.astype(f32), precision=hp) + bv.astype(f32)
    B, Sq, d = q.shape
    dh = d // n_heads

    def split(t):
        b, s, _ = t.shape
        return t.reshape(b, s, n_heads, dh).transpose(0, 2, 1, 3)   # (B, H, S, dh)

    qh, kh, vh = split(q), split(k), split(v)
    s = jnp.einsum('bhqd,bhkd->bhqk', qh, kh, precision=hp) / math.sqrt(dh)
    p = jax.nn.softmax(s, axis=-1)
    o = jnp.einsum('bhqk,bhkd->bhqd', p, vh, precision=hp)
    o = o.transpose(0, 2, 1, 3).reshape(B, Sq, d)
    if wout is not None:
        o = jnp.matmul(o, wout.astype(f32), precision=hp) + bout.astype(f32)
    return o


if __name__ == "__main__":
    key = jax.random.PRNGKey(0)
    B, Sq, Skv, d, n_heads = 2, 16, 32, 128, 4
    dtype = jnp.bfloat16          # bf16 MXU operands, f32 accumulation in the kernel

    kx, kk, kp = jax.random.split(key, 3)
    x_q = jax.random.normal(kx, (B, Sq, d), jnp.float32).astype(dtype)
    x_kv = jax.random.normal(kk, (B, Skv, d), jnp.float32).astype(dtype)
    wq, bq, wk, bk, wv, bv, wout, bout = init_mha_params(kp, d, n_heads, dtype)

    out = mha_forward(x_q, x_kv, wq, bq, wk, bk, wv, bv, wout, bout,
                      n_heads=n_heads)
    out = jax.block_until_ready(out)

    ref = mha_reference(x_q, x_kv, wq, bq, wk, bk, wv, bv, wout, bout, n_heads)
    assert out.shape == (B, Sq, d)
    max_err = jnp.max(jnp.abs(out.astype(jnp.float32) - ref))
    assert bool(max_err < 3e-2), f"max abs error {max_err}"
    print("KERNEL_OK")
</pallas_src>

<mosaic_0001>
module attributes {stable_mosaic.version = 11 : i64} {
  func.func @_mha_kernel(%arg0: i32, %arg1: i32, %arg2: memref<1x16x128xbf16, #tpu.memory_space<vmem>>, %arg3: memref<1x32x128xbf16, #tpu.memory_space<vmem>>, %arg4: memref<128x128xbf16, #tpu.memory_space<vmem>>, %arg5: memref<1x128xbf16, #tpu.memory_space<vmem>>, %arg6: memref<128x128xbf16, #tpu.memory_space<vmem>>, %arg7: memref<1x128xbf16, #tpu.memory_space<vmem>>, %arg8: memref<128x128xbf16, #tpu.memory_space<vmem>>, %arg9: memref<1x128xbf16, #tpu.memory_space<vmem>>, %arg10: memref<128x128xbf16, #tpu.memory_space<vmem>>, %arg11: memref<1x128xbf16, #tpu.memory_space<vmem>>, %arg12: memref<1x16x128xbf16, #tpu.memory_space<vmem>>) attributes {dimension_semantics = [#tpu.dimension_semantics<parallel>, #tpu.dimension_semantics<parallel>], iteration_bounds = array<i64: 2, 1>, scalar_prefetch = 0 : i64, scratch_operands = 0 : i64, tpu.core_type = #tpu.core_type<tc>, window_params = [{transform_indices = @transform_0, window_bounds = array<i64: 1, 16, 128>}, {transform_indices = @transform_1, window_bounds = array<i64: 1, 32, 128>}, {pipeline_mode = #tpu.pipeline_mode<synchronous>, transform_indices = @transform_2, window_bounds = array<i64: 128, 128>}, {pipeline_mode = #tpu.pipeline_mode<synchronous>, transform_indices = @transform_3, window_bounds = array<i64: 1, 128>}, {pipeline_mode = #tpu.pipeline_mode<synchronous>, transform_indices = @transform_4, window_bounds = array<i64: 128, 128>}, {pipeline_mode = #tpu.pipeline_mode<synchronous>, transform_indices = @transform_5, window_bounds = array<i64: 1, 128>}, {pipeline_mode = #tpu.pipeline_mode<synchronous>, transform_indices = @transform_6, window_bounds = array<i64: 128, 128>}, {pipeline_mode = #tpu.pipeline_mode<synchronous>, transform_indices = @transform_7, window_bounds = array<i64: 1, 128>}, {pipeline_mode = #tpu.pipeline_mode<synchronous>, transform_indices = @transform_8, window_bounds = array<i64: 128, 128>}, {pipeline_mode = #tpu.pipeline_mode<synchronous>, transform_indices = @transform_9, window_bounds = array<i64: 1, 128>}, {transform_indices = @transform_10, window_bounds = array<i64: 1, 16, 128>}]} {
    %c0 = arith.constant 0 : index
    %c0_0 = arith.constant 0 : index
    %c0_1 = arith.constant 0 : index
    %0 = vector.load %arg2[%c0, %c0_0, %c0_1] : memref<1x16x128xbf16, #tpu.memory_space<vmem>>, vector<1x16x128xbf16>
    %1 = vector.shape_cast %0 : vector<1x16x128xbf16> to vector<16x128xbf16>
    %c0_2 = arith.constant 0 : index
    %c0_3 = arith.constant 0 : index
    %c0_4 = arith.constant 0 : index
    %2 = vector.load %arg3[%c0_2, %c0_3, %c0_4] : memref<1x32x128xbf16, #tpu.memory_space<vmem>>, vector<1x32x128xbf16>
    %3 = vector.shape_cast %2 : vector<1x32x128xbf16> to vector<32x128xbf16>
    %c0_5 = arith.constant 0 : index
    %c0_6 = arith.constant 0 : index
    %4 = vector.load %arg4[%c0_5, %c0_6] : memref<128x128xbf16, #tpu.memory_space<vmem>>, vector<128x128xbf16>
    %cst = arith.constant dense<0.000000e+00> : vector<16x128xf32>
    %5 = tpu.matmul %1, %4, %cst {dimension_numbers = #tpu.dot_dimension_numbers<[1], [0], [0], [1], [0, 0, 1, 1], [], []>} : vector<16x128xbf16>, vector<128x128xbf16>, vector<16x128xf32> -> vector<16x128xf32>
    %c0_7 = arith.constant 0 : index
    %c0_8 = arith.constant 0 : index
    %6 = vector.load %arg5[%c0_7, %c0_8] : memref<1x128xbf16, #tpu.memory_space<vmem>>, vector<1x128xbf16>
    %7 = arith.extf %6 : vector<1x128xbf16> to vector<1x128xf32>
    %8 = vector.broadcast %7 : vector<1x128xf32> to vector<16x128xf32>
    %9 = arith.addf %5, %8 : vector<16x128xf32>
    %c0_9 = arith.constant 0 : index
    %c0_10 = arith.constant 0 : index
    %10 = vector.load %arg6[%c0_9, %c0_10] : memref<128x128xbf16, #tpu.memory_space<vmem>>, vector<128x128xbf16>
    %cst_11 = arith.constant dense<0.000000e+00> : vector<32x128xf32>
    %11 = tpu.matmul %3, %10, %cst_11 {dimension_numbers = #tpu.dot_dimension_numbers<[1], [0], [0], [1], [0, 0, 1, 1], [], []>} : vector<32x128xbf16>, vector<128x128xbf16>, vector<32x128xf32> -> vector<32x128xf32>
    %c0_12 = arith.constant 0 : index
    %c0_13 = arith.constant 0 : index
    %12 = vector.load %arg7[%c0_12, %c0_13] : memref<1x128xbf16, #tpu.memory_space<vmem>>, vector<1x128xbf16>
    %13 = arith.extf %12 : vector<1x128xbf16> to vector<1x128xf32>
    %14 = vector.broadcast %13 : vector<1x128xf32> to vector<32x128xf32>
    %15 = arith.addf %11, %14 : vector<32x128xf32>
    %c0_14 = arith.constant 0 : index
    %c0_15 = arith.constant 0 : index
    %16 = vector.load %arg8[%c0_14, %c0_15] : memref<128x128xbf16, #tpu.memory_space<vmem>>, vector<128x128xbf16>
    %cst_16 = arith.constant dense<0.000000e+00> : vector<32x128xf32>
    %17 = tpu.matmul %3, %16, %cst_16 {dimension_numbers = #tpu.dot_dimension_numbers<[1], [0], [0], [1], [0, 0, 1, 1], [], []>} : vector<32x128xbf16>, vector<128x128xbf16>, vector<32x128xf32> -> vector<32x128xf32>
    %c0_17 = arith.constant 0 : index
    %c0_18 = arith.constant 0 : index
    %18 = vector.load %arg9[%c0_17, %c0_18] : memref<1x128xbf16, #tpu.memory_space<vmem>>, vector<1x128xbf16>
    %19 = arith.extf %18 : vector<1x128xbf16> to vector<1x128xf32>
    %20 = vector.broadcast %19 : vector<1x128xf32> to vector<32x128xf32>
    %21 = arith.addf %17, %20 : vector<32x128xf32>
    %22 = arith.truncf %9 : vector<16x128xf32> to vector<16x128xbf16>
    %23 = arith.truncf %15 : vector<32x128xf32> to vector<32x128xbf16>
    %24 = arith.truncf %21 : vector<32x128xf32> to vector<32x128xbf16>
    %cst_19 = arith.constant 0.000000e+00 : f32
    %25 = vector.broadcast %cst_19 : f32 to vector<16x128xf32>
    %26 = vector.extract_strided_slice %22 {offsets = [0, 0], sizes = [16, 32], strides = [1, 1]} : vector<16x128xbf16> to vector<16x32xbf16>
    %27 = vector.extract_strided_slice %23 {offsets = [0, 0], sizes = [32, 32], strides = [1, 1]} : vector<32x128xbf16> to vector<32x32xbf16>
    %28 = vector.extract_strided_slice %24 {offsets = [0, 0], sizes = [32, 32], strides = [1, 1]} : vector<32x128xbf16> to vector<32x32xbf16>
    %cst_20 = arith.constant dense<0.000000e+00> : vector<16x32xf32>
    %29 = tpu.matmul %26, %27, %cst_20 {dimension_numbers = #tpu.dot_dimension_numbers<[1], [1], [0], [0], [0, 0, 1, 0], [], []>} : vector<16x32xbf16>, vector<32x32xbf16>, vector<16x32xf32> -> vector<16x32xf32>
    %cst_21 = arith.constant 0.176776692 : f32
    %30 = vector.broadcast %cst_21 : f32 to vector<16x32xf32>
    %31 = arith.mulf %29, %30 : vector<16x32xf32>
    %cst_22 = arith.constant dense<0xFF800000> : vector<16xf32>
    %32 = vector.multi_reduction <maximumf>, %31, %cst_22 [1] : vector<16x32xf32> to vector<16xf32>
    %33 = vector.shape_cast %32 : vector<16xf32> to vector<16x1xf32>
    %34 = vector.broadcast %33 : vector<16x1xf32> to vector<16x32xf32>
    %35 = arith.subf %31, %34 : vector<16x32xf32>
    %36 = math.exp %35 : vector<16x32xf32>
    %cst_23 = arith.constant dense<0.000000e+00> : vector<16xf32>
    %37 = vector.multi_reduction <add>, %36, %cst_23 [1] : vector<16x32xf32> to vector<16xf32>
    %38 = vector.shape_cast %37 : vector<16xf32> to vector<16x1xf32>
    %39 = vector.broadcast %38 : vector<16x1xf32> to vector<16x32xf32>
    %40 = arith.divf %36, %39 : vector<16x32xf32>
    %41 = arith.truncf %40 : vector<16x32xf32> to vector<16x32xbf16>
    %cst_24 = arith.constant dense<0.000000e+00> : vector<16x32xf32>
    %42 = tpu.matmul %41, %28, %cst_24 {dimension_numbers = #tpu.dot_dimension_numbers<[1], [0], [0], [1], [0, 0, 1, 1], [], []>} : vector<16x32xbf16>, vector<32x32xbf16>, vector<16x32xf32> -> vector<16x32xf32>
    %43 = arith.truncf %42 : vector<16x32xf32> to vector<16x32xbf16>
    %c0_25 = arith.constant 0 : index
    %c0_26 = arith.constant 0 : index
    %44 = vector.load %arg10[%c0_25, %c0_26] : memref<128x128xbf16, #tpu.memory_space<vmem>>, vector<32x128xbf16>
    %cst_27 = arith.constant dense<0.000000e+00> : vector<16x128xf32>
    %45 = tpu.matmul %43, %44, %cst_27 {dimension_numbers = #tpu.dot_dimension_numbers<[1], [0], [0], [1], [0, 0, 1, 1], [], []>} : vector<16x32xbf16>, vector<32x128xbf16>, vector<16x128xf32> -> vector<16x128xf32>
    %46 = arith.addf %25, %45 : vector<16x128xf32>
    %47 = vector.extract_strided_slice %22 {offsets = [0, 32], sizes = [16, 32], strides = [1, 1]} : vector<16x128xbf16> to vector<16x32xbf16>
    %48 = vector.extract_strided_slice %23 {offsets = [0, 32], sizes = [32, 32], strides = [1, 1]} : vector<32x128xbf16> to vector<32x32xbf16>
    %49 = vector.extract_strided_slice %24 {offsets = [0, 32], sizes = [32, 32], strides = [1, 1]} : vector<32x128xbf16> to vector<32x32xbf16>
    %cst_28 = arith.constant dense<0.000000e+00> : vector<16x32xf32>
    %50 = tpu.matmul %47, %48, %cst_28 {dimension_numbers = #tpu.dot_dimension_numbers<[1], [1], [0], [0], [0, 0, 1, 0], [], []>} : vector<16x32xbf16>, vector<32x32xbf16>, vector<16x32xf32> -> vector<16x32xf32>
    %cst_29 = arith.constant 0.176776692 : f32
    %51 = vector.broadcast %cst_29 : f32 to vector<16x32xf32>
    %52 = arith.mulf %50, %51 : vector<16x32xf32>
    %cst_30 = arith.constant dense<0xFF800000> : vector<16xf32>
    %53 = vector.multi_reduction <maximumf>, %52, %cst_30 [1] : vector<16x32xf32> to vector<16xf32>
    %54 = vector.shape_cast %53 : vector<16xf32> to vector<16x1xf32>
    %55 = vector.broadcast %54 : vector<16x1xf32> to vector<16x32xf32>
    %56 = arith.subf %52, %55 : vector<16x32xf32>
    %57 = math.exp %56 : vector<16x32xf32>
    %cst_31 = arith.constant dense<0.000000e+00> : vector<16xf32>
    %58 = vector.multi_reduction <add>, %57, %cst_31 [1] : vector<16x32xf32> to vector<16xf32>
    %59 = vector.shape_cast %58 : vector<16xf32> to vector<16x1xf32>
    %60 = vector.broadcast %59 : vector<16x1xf32> to vector<16x32xf32>
    %61 = arith.divf %57, %60 : vector<16x32xf32>
    %62 = arith.truncf %61 : vector<16x32xf32> to vector<16x32xbf16>
    %cst_32 = arith.constant dense<0.000000e+00> : vector<16x32xf32>
    %63 = tpu.matmul %62, %49, %cst_32 {dimension_numbers = #tpu.dot_dimension_numbers<[1], [0], [0], [1], [0, 0, 1, 1], [], []>} : vector<16x32xbf16>, vector<32x32xbf16>, vector<16x32xf32> -> vector<16x32xf32>
    %64 = arith.truncf %63 : vector<16x32xf32> to vector<16x32xbf16>
    %c32 = arith.constant 32 : index
    %c0_33 = arith.constant 0 : index
    %65 = vector.load %arg10[%c32, %c0_33] : memref<128x128xbf16, #tpu.memory_space<vmem>>, vector<32x128xbf16>
    %cst_34 = arith.constant dense<0.000000e+00> : vector<16x128xf32>
    %66 = tpu.matmul %64, %65, %cst_34 {dimension_numbers = #tpu.dot_dimension_numbers<[1], [0], [0], [1], [0, 0, 1, 1], [], []>} : vector<16x32xbf16>, vector<32x128xbf16>, vector<16x128xf32> -> vector<16x128xf32>
    %67 = arith.addf %46, %66 : vector<16x128xf32>
    %68 = vector.extract_strided_slice %22 {offsets = [0, 64], sizes = [16, 32], strides = [1, 1]} : vector<16x128xbf16> to vector<16x32xbf16>
    %69 = vector.extract_strided_slice %23 {offsets = [0, 64], sizes = [32, 32], strides = [1, 1]} : vector<32x128xbf16> to vector<32x32xbf16>
    %70 = vector.extract_strided_slice %24 {offsets = [0, 64], sizes = [32, 32], strides = [1, 1]} : vector<32x128xbf16> to vector<32x32xbf16>
    %cst_35 = arith.constant dense<0.000000e+00> : vector<16x32xf32>
    %71 = tpu.matmul %68, %69, %cst_35 {dimension_numbers = #tpu.dot_dimension_numbers<[1], [1], [0], [0], [0, 0, 1, 0], [], []>} : vector<16x32xbf16>, vector<32x32xbf16>, vector<16x32xf32> -> vector<16x32xf32>
    %cst_36 = arith.constant 0.176776692 : f32
    %72 = vector.broadcast %cst_36 : f32 to vector<16x32xf32>
    %73 = arith.mulf %71, %72 : vector<16x32xf32>
    %cst_37 = arith.constant dense<0xFF800000> : vector<16xf32>
    %74 = vector.multi_reduction <maximumf>, %73, %cst_37 [1] : vector<16x32xf32> to vector<16xf32>
    %75 = vector.shape_cast %74 : vector<16xf32> to vector<16x1xf32>
    %76 = vector.broadcast %75 : vector<16x1xf32> to vector<16x32xf32>
    %77 = arith.subf %73, %76 : vector<16x32xf32>
    %78 = math.exp %77 : vector<16x32xf32>
    %cst_38 = arith.constant dense<0.000000e+00> : vector<16xf32>
    %79 = vector.multi_reduction <add>, %78, %cst_38 [1] : vector<16x32xf32> to vector<16xf32>
    %80 = vector.shape_cast %79 : vector<16xf32> to vector<16x1xf32>
    %81 = vector.broadcast %80 : vector<16x1xf32> to vector<16x32xf32>
    %82 = arith.divf %78, %81 : vector<16x32xf32>
    %83 = arith.truncf %82 : vector<16x32xf32> to vector<16x32xbf16>
    %cst_39 = arith.constant dense<0.000000e+00> : vector<16x32xf32>
    %84 = tpu.matmul %83, %70, %cst_39 {dimension_numbers = #tpu.dot_dimension_numbers<[1], [0], [0], [1], [0, 0, 1, 1], [], []>} : vector<16x32xbf16>, vector<32x32xbf16>, vector<16x32xf32> -> vector<16x32xf32>
    %85 = arith.truncf %84 : vector<16x32xf32> to vector<16x32xbf16>
    %c64 = arith.constant 64 : index
    %c0_40 = arith.constant 0 : index
    %86 = vector.load %arg10[%c64, %c0_40] : memref<128x128xbf16, #tpu.memory_space<vmem>>, vector<32x128xbf16>
    %cst_41 = arith.constant dense<0.000000e+00> : vector<16x128xf32>
    %87 = tpu.matmul %85, %86, %cst_41 {dimension_numbers = #tpu.dot_dimension_numbers<[1], [0], [0], [1], [0, 0, 1, 1], [], []>} : vector<16x32xbf16>, vector<32x128xbf16>, vector<16x128xf32> -> vector<16x128xf32>
    %88 = arith.addf %67, %87 : vector<16x128xf32>
    %89 = vector.extract_strided_slice %22 {offsets = [0, 96], sizes = [16, 32], strides = [1, 1]} : vector<16x128xbf16> to vector<16x32xbf16>
    %90 = vector.extract_strided_slice %23 {offsets = [0, 96], sizes = [32, 32], strides = [1, 1]} : vector<32x128xbf16> to vector<32x32xbf16>
    %91 = vector.extract_strided_slice %24 {offsets = [0, 96], sizes = [32, 32], strides = [1, 1]} : vector<32x128xbf16> to vector<32x32xbf16>
    %cst_42 = arith.constant dense<0.000000e+00> : vector<16x32xf32>
    %92 = tpu.matmul %89, %90, %cst_42 {dimension_numbers = #tpu.dot_dimension_numbers<[1], [1], [0], [0], [0, 0, 1, 0], [], []>} : vector<16x32xbf16>, vector<32x32xbf16>, vector<16x32xf32> -> vector<16x32xf32>
    %cst_43 = arith.constant 0.176776692 : f32
    %93 = vector.broadcast %cst_43 : f32 to vector<16x32xf32>
    %94 = arith.mulf %92, %93 : vector<16x32xf32>
    %cst_44 = arith.constant dense<0xFF800000> : vector<16xf32>
    %95 = vector.multi_reduction <maximumf>, %94, %cst_44 [1] : vector<16x32xf32> to vector<16xf32>
    %96 = vector.shape_cast %95 : vector<16xf32> to vector<16x1xf32>
    %97 = vector.broadcast %96 : vector<16x1xf32> to vector<16x32xf32>
    %98 = arith.subf %94, %97 : vector<16x32xf32>
    %99 = math.exp %98 : vector<16x32xf32>
    %cst_45 = arith.constant dense<0.000000e+00> : vector<16xf32>
    %100 = vector.multi_reduction <add>, %99, %cst_45 [1] : vector<16x32xf32> to vector<16xf32>
    %101 = vector.shape_cast %100 : vector<16xf32> to vector<16x1xf32>
    %102 = vector.broadcast %101 : vector<16x1xf32> to vector<16x32xf32>
    %103 = arith.divf %99, %102 : vector<16x32xf32>
    %104 = arith.truncf %103 : vector<16x32xf32> to vector<16x32xbf16>
    %cst_46 = arith.constant dense<0.000000e+00> : vector<16x32xf32>
    %105 = tpu.matmul %104, %91, %cst_46 {dimension_numbers = #tpu.dot_dimension_numbers<[1], [0], [0], [1], [0, 0, 1, 1], [], []>} : vector<16x32xbf16>, vector<32x32xbf16>, vector<16x32xf32> -> vector<16x32xf32>
    %106 = arith.truncf %105 : vector<16x32xf32> to vector<16x32xbf16>
    %c96 = arith.constant 96 : index
    %c0_47 = arith.constant 0 : index
    %107 = vector.load %arg10[%c96, %c0_47] : memref<128x128xbf16, #tpu.memory_space<vmem>>, vector<32x128xbf16>
    %cst_48 = arith.constant dense<0.000000e+00> : vector<16x128xf32>
    %108 = tpu.matmul %106, %107, %cst_48 {dimension_numbers = #tpu.dot_dimension_numbers<[1], [0], [0], [1], [0, 0, 1, 1], [], []>} : vector<16x32xbf16>, vector<32x128xbf16>, vector<16x128xf32> -> vector<16x128xf32>
    %109 = arith.addf %88, %108 : vector<16x128xf32>
    %c0_49 = arith.constant 0 : index
    %c0_50 = arith.constant 0 : index
    %110 = vector.load %arg11[%c0_49, %c0_50] : memref<1x128xbf16, #tpu.memory_space<vmem>>, vector<1x128xbf16>
    %111 = arith.extf %110 : vector<1x128xbf16> to vector<1x128xf32>
    %112 = vector.broadcast %111 : vector<1x128xf32> to vector<16x128xf32>
    %113 = arith.addf %109, %112 : vector<16x128xf32>
    %114 = arith.truncf %113 : vector<16x128xf32> to vector<16x128xbf16>
    %c0_51 = arith.constant 0 : index
    %c0_52 = arith.constant 0 : index
    %c0_53 = arith.constant 0 : index
    %115 = vector.load %arg12[%c0_51, %c0_52, %c0_53] : memref<1x16x128xbf16, #tpu.memory_space<vmem>>, vector<1x16x128xbf16>
    %116 = vector.shape_cast %115 : vector<1x16x128xbf16> to vector<16x128xbf16>
    %117 = vector.shape_cast %114 : vector<16x128xbf16> to vector<1x16x128xbf16>
    tpu.vector_store %arg12[%c0_51, %c0_52, %c0_53], %117 {strides = array<i32>} : memref<1x16x128xbf16, #tpu.memory_space<vmem>>, vector<1x16x128xbf16>,
    return
  }
  func.func @transform_0(%arg0: i32, %arg1: i32) -> (i32, i32, i32) {
    %c0_i32 = arith.constant 0 : i32
    %c0_i32_0 = arith.constant 0 : i32
    return %arg0, %arg1, %c0_i32 : i32, i32, i32
  }
  func.func @transform_1(%arg0: i32, %arg1: i32) -> (i32, i32, i32) {
    %c0_i32 = arith.constant 0 : i32
    %c0_i32_0 = arith.constant 0 : i32
    %c0_i32_1 = arith.constant 0 : i32
    return %arg0, %c0_i32, %c0_i32_0 : i32, i32, i32
  }
  func.func @transform_2(%arg0: i32, %arg1: i32) -> (i32, i32) {
    %c0_i32 = arith.constant 0 : i32
    %c0_i32_0 = arith.constant 0 : i32
    %c0_i32_1 = arith.constant 0 : i32
    return %c0_i32, %c0_i32_0 : i32, i32
  }
  func.func @transform_3(%arg0: i32, %arg1: i32) -> (i32, i32) {
    %c0_i32 = arith.constant 0 : i32
    %c0_i32_0 = arith.constant 0 : i32
    %c0_i32_1 = arith.constant 0 : i32
    return %c0_i32, %c0_i32_0 : i32, i32
  }
  func.func @transform_4(%arg0: i32, %arg1: i32) -> (i32, i32) {
    %c0_i32 = arith.constant 0 : i32
    %c0_i32_0 = arith.constant 0 : i32
    %c0_i32_1 = arith.constant 0 : i32
    return %c0_i32, %c0_i32_0 : i32, i32
  }
  func.func @transform_5(%arg0: i32, %arg1: i32) -> (i32, i32) {
    %c0_i32 = arith.constant 0 : i32
    %c0_i32_0 = arith.constant 0 : i32
    %c0_i32_1 = arith.constant 0 : i32
    return %c0_i32, %c0_i32_0 : i32, i32
  }
  func.func @transform_6(%arg0: i32, %arg1: i32) -> (i32, i32) {
    %c0_i32 = arith.constant 0 : i32
    %c0_i32_0 = arith.constant 0 : i32
    %c0_i32_1 = arith.constant 0 : i32
    return %c0_i32, %c0_i32_0 : i32, i32
  }
  func.func @transform_7(%arg0: i32, %arg1: i32) -> (i32, i32) {
    %c0_i32 = arith.constant 0 : i32
    %c0_i32_0 = arith.constant 0 : i32
    %c0_i32_1 = arith.constant 0 : i32
    return %c0_i32, %c0_i32_0 : i32, i32
  }
  func.func @transform_8(%arg0: i32, %arg1: i32) -> (i32, i32) {
    %c0_i32 = arith.constant 0 : i32
    %c0_i32_0 = arith.constant 0 : i32
    %c0_i32_1 = arith.constant 0 : i32
    return %c0_i32, %c0_i32_0 : i32, i32
  }
  func.func @transform_9(%arg0: i32, %arg1: i32) -> (i32, i32) {
    %c0_i32 = arith.constant 0 : i32
    %c0_i32_0 = arith.constant 0 : i32
    %c0_i32_1 = arith.constant 0 : i32
    return %c0_i32, %c0_i32_0 : i32, i32
  }
  func.func @transform_10(%arg0: i32, %arg1: i32) -> (i32, i32, i32) {
    %c0_i32 = arith.constant 0 : i32
    %c0_i32_0 = arith.constant 0 : i32
    return %arg0, %arg1, %c0_i32 : i32, i32, i32
  }
}

</mosaic_0001>

<bundles_post_ra>
// kernel: tpu_custom_call.1
= control target key start
LH: loop header
LB: loop body
LE: loop exit
PB: predicated region body
PF: predicated region fallthrough
CT: control target
= control target key end

     0   :  { %s3198_s0 = inlined_call_operand.hbm [shape: bf16[2,16,128], index: 0, kind: input, shape index: {}]   ;;  %s3199_s1 = inlined_call_operand.hbm [shape: bf16[2,32,128], index: 1, kind: input, shape index: {}]   ;;  %s3200_s2 = inlined_call_operand.hbm [shape: bf16[128,128], index: 2, kind: input, shape index: {}]   ;;  %s3201_s3 = inlined_call_operand.vmem [shape: bf16[1,128], index: 3, kind: input, shape index: {}]   ;;  %s3202_s4 = inlined_call_operand.hbm [shape: bf16[128,128], index: 4, kind: input, shape index: {}]   ;;  %s3203_s5 = inlined_call_operand.vmem [shape: bf16[1,128], index: 5, kind: input, shape index: {}]   ;;  %s3204_s6 = inlined_call_operand.hbm [shape: bf16[128,128], index: 6, kind: input, shape index: {}]   ;;  %s3205_s7 = inlined_call_operand.vmem [shape: bf16[1,128], index: 7, kind: input, shape index: {}]   ;;  %s3206_s8 = inlined_call_operand.hbm [shape: bf16[128,128], index: 8, kind: input, shape index: {}]   ;;  %s3207_s9 = inlined_call_operand.vmem [shape: bf16[1,128], index: 9, kind: input, shape index: {}]   ;;  %s3208_s10 = inlined_call_operand.hbm [shape: bf16[2,16,128], index: 10, kind: output, shape index: {}]  }
   0x1   :  { %3217 = sst [smem:[#allocation23_spill]] %s3198_s0 }
   0x2   :  { %3218 = sst [smem:[#allocation24_spill]] %s3200_s2 }
   0x3   :  { %3219 = sst [smem:[#allocation25_spill]] %s3202_s4 }
   0x4   :  { %3220 = sst [smem:[#allocation26_spill]] %s3204_s6 }
   0x5   :  { %3221 = sst [smem:[#allocation27_spill]] %s3205_s7 }
   0x6   :  { %3222 = sst [smem:[#allocation28_spill]] %s3207_s9 }
   0x7   :  { %3223 = sst [smem:[#allocation29_spill]] %s3208_s10 }
   0x8   :  { %15 = vsyncpa [#allocation3], 0 }
   0x9   :  { %17 = vsyncpa [#allocation3 + $0x1], 0 }
   0xa   :  { %18 = vsyncpa [#allocation6], 0 }
   0xb   :  { %20 = vsyncpa [#allocation6 + $0x1], 0 }
   0xc   :  { %21 = vsyncpa [#allocation9], 0 }
   0xd   :  { %22 = vsyncpa [#allocation12], 0 }
   0xe   :  { %23 = vsyncpa [#allocation4], 0 }
   0xf   :  { %25 = vsyncpa [#allocation4 + $0x1], 0  ;;  %s2655_s13 = smov 0   ;;  %s2657_s14 = smov 0  }
  0x10   :  { %s2659_s15 = smov 0   ;;  %s2661_s16 = smov 0  }
  0x11   :  { %s2663_s17 = smov 0   ;;  %s2665_s18 = smov 0  }
  0x12 LB: > { %3224 = sst [smem:[#allocation20_spill]] %s2563_s13  ;;  %s2686_s19 = sadd.s32 4294967295, %s2583_s18   ;;  %s2583_s18 = sphi %s2665_s18, %s31_s18   ;;  %s2579_s17 = sphi %s2663_s17, %s3262_s17   ;;  %s2575_s16 = sphi %s2661_s16, %s3261_s16   ;;  %s2571_s15 = sphi %s2659_s15, %s3260_s15   ;;  %s2567_s14 = sphi %s2657_s14, %s3259_s14   ;;  %s2563_s13 = sphi %s2655_s13, %s3258_s13  }
  0x13   : > { %3225 = sst [smem:[#allocation21_spill]] %s2575_s16  ;;  %s1824_s20 = sadd.s32 4294967294, %s2583_s18  }
  0x14   : > { %p65_p0 = scmp.ne.s32.totalorder %s2567_s14, %s2563_s13  ;;  %p3211_p1 = scmp.eq.s32.totalorder %s2686_s19, 0 }
  0x15   : > { %p291_p3 = scmp.eq.s32.totalorder %s1824_s20, 1  ;;  %p1825_p5 = scmp.ge.s32.totalorder %s2583_s18, 1 }
  0x16   : > { %p2695_p4 = por %p3211_p1, %p65_p0  ;;  %p298_p7 = scmp.lt.s32.totalorder %s2583_s18, 3 }
  0x17   : > { %p2700_p6 = por %p291_p3, %p65_p0  ;;  %s2585_s24 = smov [#allocation7]  }
  0x18   : > { %s3226_s21 = scalar_select %p2695_p4, 1, 0 }
  0x19   : > { %s3227_s22 = scalar_select %p2700_p6, 1, 0 }
  0x1a   : > { %p2705_p8 = pnand %p1825_p5, %p298_p7  ;;  %s310_s25 = sshll.u32 %s2585_s24, 4  ;;  %s2709_s25 = int_to_ptr.vmem [resolvable:$true] %s310_s25 }
  0x1b   : > { %3228 = sst [smem:[#allocation22_spill]] %s3227_s22  ;;  %s2586_s27 = smov [#allocation8]  }
  0x1c   : > { %s3229_s23 = scalar_select %p2705_p8, 1, 0 }
  0x1d   : > { %p2152_p9 = pneg %p2705_p8  ;;  %s326_s28 = sshll.u32 %s2586_s27, 4  ;;  %s2720_s28 = int_to_ptr.vmem [resolvable:$true] %s326_s28 }
  0x1e   : > { %s2587_s29 = smov [#allocation10]   ;;  %s3231_s2 = sld [smem:[#allocation24_spill]] }
  0x1f   : > { %p2716_p11 = pnand %p2152_p9, %p3211_p1  ;;  %s2722_s30 = sshll.u32 %s2587_s29, 4  ;;  %s343_s30 = int_to_ptr.vmem [resolvable:$true] %s2722_s30 }
  0x21   : > { %p2732_p13 = pneg %p2716_p11 }
  0x24   : > { %s2313_s20 = scalar_lea.hbm %s3231_s2, 1024 }
  0x25   : > { %p2314_p12 = scmp.ne.s32.totalorder %s3231_s2, %s2313_s20  ;;  %p2320_p5 = scmp.lt.u32.totalorder %s2313_s20, %s3231_s2 }
  0x27   : > { %p2316_p0 = pnand %p2732_p13, %p2314_p12 }
  0x29   : > { %p2317_p3 = pneg %p2316_p0 }
  0x2b   : > { %p2322_p7 = pnand %p2320_p5, %p2317_p3 }
  0x2d   : > { %2325 = shalt.err (!%p2322_p7)
}
  0x2e   : > { %s2326_s22 = scalar_lea.vmem %s2709_s25, 1024  ;;  %p2334_p2 = scmp.lt.s32.totalorder %s2709_s25, %s2709_s25 }
  0x2f   : > { %p2327_p9 = scmp.ne.s32.totalorder %s2709_s25, %s2326_s22  ;;  %p2335_p6 = scmp.lt.s32.totalorder %s2326_s22, %s2326_s22 }
  0x31   : > { %p2329_p10 = pnand %p2327_p9, %p2732_p13  ;;  %p2336_p12 = por %p2335_p6, %p2334_p2 }
  0x33   : > { %p2330_p1 = pneg %p2329_p10 }
  0x35   : > { %p2337_p0 = pnand %p2336_p12, %p2330_p1 }
  0x37   : > { %2340 = shalt.err (!%p2337_p0)
}
  0x38   : > { %s3215_s11 = smov 64   ;;  %s2589_s12 = smov 4  }
  0x39   : > { %2155 = dma.hbm_to_vmem [thread:$0]  (!%p2716_p11), %s3231_s2, 1024, %s2709_s25, [#allocation6], %s3215_s11, %s3215_s11, %s2589_s12  }
  0x3a   : > { %s3233_s4 = sld [smem:[#allocation25_spill]] }
  0x40   : > { %s2341_s22 = scalar_lea.hbm %s3233_s4, 1024 }
  0x41   : > { %p2342_p1 = scmp.ne.s32.totalorder %s3233_s4, %s2341_s22  ;;  %p2348_p10 = scmp.lt.u32.totalorder %s2341_s22, %s3233_s4 }
  0x43   : > { %p2344_p2 = pnand %p2342_p1, %p2732_p13 }
  0x45   : > { %p2345_p6 = pneg %p2344_p2 }
  0x47   : > { %p2350_p3 = pnand %p2348_p10, %p2345_p6 }
  0x49   : > { %2353 = shalt.err (!%p2350_p3)
}
  0x4a   : > { %s2354_s25 = scalar_lea.vmem %s2720_s28, 1024  ;;  %p2362_p12 = scmp.lt.s32.totalorder %s2720_s28, %s2720_s28 }
  0x4b   : > { %p2355_p5 = scmp.ne.s32.totalorder %s2720_s28, %s2354_s25  ;;  %p2363_p0 = scmp.lt.s32.totalorder %s2354_s25, %s2354_s25 }
  0x4d   : > { %p2357_p7 = pnand %p2355_p5, %p2732_p13  ;;  %p2364_p1 = por %p2363_p0, %p2362_p12 }
  0x4f   : > { %p2358_p9 = pneg %p2357_p7 }
  0x51   : > { %p2365_p2 = pnand %p2364_p1, %p2358_p9 }
  0x53   : > { %2368 = shalt.err (!%p2365_p2)
}
  0x54   : > { %2158 = dma.hbm_to_vmem [thread:$0]  (!%p2716_p11), %s3233_s4, 1024, %s2720_s28, [#allocation9], %s3215_s11, %s3215_s11, %s2589_s12  }
  0x55   : > { %s3234_s6 = sld [smem:[#allocation26_spill]] }
  0x5b   : > { %s2369_s20 = scalar_lea.hbm %s3234_s6, 1024 }
  0x5c   : > { %p2370_p6 = scmp.ne.s32.totalorder %s3234_s6, %s2369_s20  ;;  %p2376_p5 = scmp.lt.u32.totalorder %s2369_s20, %s3234_s6 }
  0x5e   : > { %p2372_p10 = pnand %p2370_p6, %p2732_p13 }
  0x60   : > { %p2373_p3 = pneg %p2372_p10 }
  0x62   : > { %p2378_p7 = pnand %p2376_p5, %p2373_p3 }
  0x64   : > { %2381 = shalt.err (!%p2378_p7)
}
  0x65   : > { %s2382_s25 = scalar_lea.vmem %s343_s30, 1024  ;;  %p2390_p1 = scmp.lt.s32.totalorder %s343_s30, %s343_s30 }
  0x66   : > { %p2383_p9 = scmp.ne.s32.totalorder %s343_s30, %s2382_s25  ;;  %p2391_p2 = scmp.lt.s32.totalorder %s2382_s25, %s2382_s25 }
  0x68   : > { %p2385_p12 = pnand %p2383_p9, %p2732_p13  ;;  %p2392_p4 = por %p2391_p2, %p2390_p1 }
  0x6a   : > { %p2386_p0 = pneg %p2385_p12 }
  0x6c   : > { %p2393_p8 = pnand %p2392_p4, %p2386_p0 }
  0x6e   : > { %2396 = shalt.err (!%p2393_p8)
}
  0x6f   : > { %2161 = dma.hbm_to_vmem [thread:$0]  (!%p2716_p11), %s3234_s6, 1024, %s343_s30, [#allocation9], %s3215_s11, %s3215_s11, %s2589_s12  }
  0x70   : > { %s2590_s9 = smov [#allocation11]   ;;  %s2397_s24 = scalar_lea.hbm %s3206_s8, 1024 }
  0x71   : > { %s358_s10 = sshll.u32 %s2590_s9, 4  ;;  %p2398_p4 = scmp.ne.s32.totalorder %s3206_s8, %s2397_s24  ;;  %s359_s10 = int_to_ptr.vmem [resolvable:$true] %s358_s10 }
  0x72   : > { %p2404_p10 = scmp.lt.u32.totalorder %s2397_s24, %s3206_s8 }
  0x73   : > { %p2400_p8 = pnand %p2398_p4, %p2732_p13 }
  0x75   : > { %p2401_p6 = pneg %p2400_p8 }
  0x77   : > { %p2406_p3 = pnand %p2404_p10, %p2401_p6 }
  0x79   : > { %2409 = shalt.err (!%p2406_p3)
}
  0x7a   : > { %s2410_s30 = scalar_lea.vmem %s359_s10, 1024  ;;  %p2418_p12 = scmp.lt.s32.totalorder %s359_s10, %s359_s10 }
  0x7b   : > { %p2411_p5 = scmp.ne.s32.totalorder %s359_s10, %s2410_s30  ;;  %p2419_p0 = scmp.lt.s32.totalorder %s2410_s30, %s2410_s30 }
  0x7d   : > { %p2413_p7 = pnand %p2411_p5, %p2732_p13  ;;  %p2420_p1 = por %p2419_p0, %p2418_p12 }
  0x7f   : > { %p2414_p9 = pneg %p2413_p7 }
  0x81   : > { %p2421_p2 = pnand %p2420_p1, %p2414_p9 }
  0x83   : > { %2424 = shalt.err (!%p2421_p2)
}
  0x84   : > { %2164 = dma.hbm_to_vmem [thread:$0]  (!%p2716_p11), %s3206_s8, 1024, %s359_s10, [#allocation12], %s3215_s11, %s3215_s11, %s2589_s12  }
  0x85   : > { %s43_s13 = sadd.s32 1, %s2579_s17  ;;  %s52_s26 = sadd.s32 1, %s2571_s15 }
  0x86   : > { %p45_p13 = scmp.ge.s32.totalorder %s43_s13, 2  ;;  %p59_p4 = scmp.ne.s32.totalorder %s2571_s15, %s2567_s14 }
  0x87   : > { %p60_p8 = scmp.eq.s32.totalorder %s2583_s18, 0  ;;  %p2180_p6 = scmp.lt.s32.totalorder %s2583_s18, 2 }
  0x88   : > { %s3264_s13 = smov (%p45_p13, %s43_s13), 0  ;;  %p3235_p3 = scmp.eq.s32.totalorder %s2686_s19, 1 }
  0x89   : > { %p61_p10 = por %p60_p8, %p59_p4  ;;  %s47_s16 = ssub.s32 %s2579_s17, %s3264_s13 }
  0x8a   : > { %p2835_p5 = por %p3235_p3, %p59_p4  ;;  %s2842_s20 = sand.u32 1, %s2571_s15  }
  0x8b   : > { %p50_p11 = scmp.eq.s32.totalorder %s47_s16, 0  ;;  %s1831_s10 = sshll.u32 %s2842_s20, 3 }
  0x8c   : > { %s1899_s24 = sshll.u32 %s2579_s17, 7  ;;  %s3237_s0 = sld [smem:[#allocation23_spill]] }
  0x8d   : > { %s2847_s27 = scalar_select %p50_p11, %s2571_s15, %s52_s26  }
  0x8e   : > { %s379_s30 = scalar_lea.vmem [#allocation2], %s1831_s10  ;;  %p2856_p7 = pnand %p2180_p6, %p61_p10 }
  0x8f   : > { %s388_s28 = sshll.u32 %s379_s30, 4  ;;  %s376_s16 = scalar_lea.sflag [#allocation3], %s2842_s20  ;;  %s2860_s28 = int_to_ptr.vmem [resolvable:$true] %s388_s28 }
  0x90   : > { %p2427_p12 = pneg %p2856_p7 }
  0x92   : > { %s2852_s25 = scalar_lea.hbm %s3237_s0, %s1899_s24  ;;  %s2430_s22 = scalar_lea.hbm %s3237_s0, 256 }
  0x93   : > { %s2425_s29 = scalar_lea.hbm %s2852_s25, 128  ;;  %p2431_p2 = scmp.lt.u32.totalorder %s2852_s25, %s3237_s0 }
  0x94   : > { %p2426_p9 = scmp.ne.s32.totalorder %s2852_s25, %s2425_s29  ;;  %p2432_p13 = scmp.lt.u32.totalorder %s2430_s22, %s2425_s29 }
  0x95   : > { %p2434_p8 = scmp.lt.u32.totalorder %s2425_s29, %s2852_s25 }
  0x96   : > { %p2428_p0 = pnand %p2427_p12, %p2426_p9  ;;  %p2433_p4 = por %p2432_p13, %p2431_p2 }
  0x98   : > { %p2429_p1 = pneg %p2428_p0  ;;  %p2435_p6 = por %p2434_p8, %p2433_p4 }
  0x9a   : > { %p2436_p10 = pnand %p2435_p6, %p2429_p1 }
  0x9c   : > { %2439 = shalt.err (!%p2436_p10)
}
  0x9d   : > { %s2440_s26 = scalar_lea.vmem %s2860_s28, 128  ;;  %s2591_s10 = smov [#allocation2]  }
  0x9e   : > { %p2441_p3 = scmp.ne.s32.totalorder %s2860_s28, %s2440_s26  ;;  %s2445_s24 = sshll.u32 %s2591_s10, 4  ;;  %s2446_s24 = int_to_ptr.vmem [resolvable:$false] %s2445_s24 }
  0x9f   : > { %s2447_s11 = scalar_lea.vmem %s2446_s24, 256  ;;  %p2448_p0 = scmp.lt.s32.totalorder %s2860_s28, %s2446_s24 }
  0xa0   : > { %p2443_p11 = pnand %p2441_p3, %p2427_p12  ;;  %p2449_p2 = scmp.lt.s32.totalorder %s2447_s11, %s2440_s26 }
  0xa2   : > { %p2444_p9 = pneg %p2443_p11  ;;  %p2450_p13 = por %p2449_p2, %p2448_p0 }
  0xa4   : > { %p2451_p4 = pnand %p2450_p13, %p2444_p9 }
  0xa6   : > { %2454 = shalt.err (!%p2451_p4)
}
  0xa7   : > { %s3239_s29 = smov 64   ;;  %s1834_s22 = sshll.u32 %s2842_s20, 4 }
  0xa8   : > { %2168 = dma.hbm_to_vmem [thread:$0]  (!%p2856_p7), %s2852_s25, 128, %s2860_s28, %s376_s16, %s3239_s29, %s3239_s29, %s2589_s12  }
  0xa9   : > { %s1900_s30 = sshll.u32 %s2579_s17, 8  ;;  %s402_s11 = scalar_lea.vmem [#allocation5], %s1834_s22 }
  0xaa   : > { %s2899_s24 = scalar_lea.hbm %s3199_s1, %s1900_s30  ;;  %s409_s0 = sshll.u32 %s402_s11, 4  ;;  %s2901_s0 = int_to_ptr.vmem [resolvable:$true] %s409_s0 }
  0xab   : > { %s3240_s2 = sand.u32 1, %s2583_s18   ;;  %s2455_s6 = scalar_lea.hbm %s2899_s24, 256 }
  0xac   : > { %s2905_s4 = scalar_lea.sflag [#allocation6], %s3240_s2  ;;  %p2456_p1 = scmp.ne.s32.totalorder %s2899_s24, %s2455_s6 }
  0xad   : > { %s2460_s28 = scalar_lea.hbm %s3199_s1, 512  ;;  %p2461_p10 = scmp.lt.u32.totalorder %s2899_s24, %s3199_s1 }
  0xae   : > { %p2458_p8 = pnand %p2456_p1, %p2427_p12  ;;  %p2462_p3 = scmp.lt.u32.totalorder %s2460_s28, %s2455_s6 }
  0xaf   : > { %p2464_p9 = scmp.lt.u32.totalorder %s2455_s6, %s2899_s24 }
  0xb0   : > { %p2459_p6 = pneg %p2458_p8  ;;  %p2463_p11 = por %p2462_p3, %p2461_p10 }
  0xb2   : > { %p2465_p0 = por %p2464_p9, %p2463_p11 }
  0xb4   : > { %p2466_p2 = pnand %p2465_p0, %p2459_p6 }
  0xb6   : > { %2469 = shalt.err (!%p2466_p2)
}
  0xb7   : > { %s2470_s2 = scalar_lea.vmem %s2901_s0, 256  ;;  %s2592_s22 = smov [#allocation5]  }
  0xb8   : > { %p2471_p13 = scmp.ne.s32.totalorder %s2901_s0, %s2470_s2  ;;  %s2475_s26 = sshll.u32 %s2592_s22, 4  ;;  %s2476_s26 = int_to_ptr.vmem [resolvable:$false] %s2475_s26 }
  0xb9   : > { %s2477_s10 = scalar_lea.vmem %s2476_s26, 512  ;;  %p2478_p8 = scmp.lt.s32.totalorder %s2901_s0, %s2476_s26 }
  0xba   : > { %p2473_p4 = pnand %p2471_p13, %p2427_p12  ;;  %p2479_p10 = scmp.lt.s32.totalorder %s2477_s10, %s2470_s2 }
  0xbc   : > { %p2474_p1 = pneg %p2473_p4  ;;  %p2480_p3 = por %p2479_p10, %p2478_p8 }
  0xbe   : > { %p2481_p11 = pnand %p2480_p3, %p2474_p1 }
  0xc0   : > { %2484 = shalt.err (!%p2481_p11)
}
  0xc1   : > { %2171 = dma.hbm_to_vmem [thread:$0]  (!%p2856_p7), %s2899_s24, 256, %s2901_s0, %s2905_s4, %s3239_s29, %s3239_s29, %s2589_s12  }
  0xc2   : > { %p3241_p12 = scmp.ne.s32.totalorder %s3229_s23, 0 }
  0xc3   : > { %s2937_s6 = sand.u32 (!%p3241_p12), 1, %s2567_s14   ;;  %p3242_p6 = scmp.ne.s32.totalorder (!%p3241_p12), %s3226_s21, 0 }
  0xc4   : > { %421 = sbr.rel (%p3241_p12) target bundleno = 3010 (0xbc2), region = 60  ;;  %s1838_s11 = sshll.u32 (!%p3241_p12), %s2937_s6, 3 }
  0xc5   : > { %s424_s20 = scalar_lea.sflag (!%p3241_p12), [#allocation3], %s2937_s6  ;;  %s2943_s7 = scalar_lea.vmem (!%p3241_p12), [#allocation2], %s1838_s11 }
  0xcb   : > { %2538 = dma.done.wait (%p3242_p6), %s424_s20, 128  }
  0xcc   : > { %2540 = vsyncadd (%p3242_p6), %s424_s20, 4294967168  ;;  %s432_s0 = sand.u32 1, %s2686_s19   ;;  %s1839_s4 = sshll.u32 %s2937_s6, 4 }
  0xcd   : > { %s433_s23 = scalar_lea.sflag [#allocation6], %s432_s0  ;;  %s2951_s12 = scalar_lea.vmem [#allocation5], %s1839_s4 }
  0xce   : > { %2542 = dma.done.wait (%p3242_p6), %s433_s23, 256  }
  0xcf   : > { %2544 = vsyncadd (%p3242_p6), %s433_s23, 4294967040  ;;  %p3243_p7 = scmp.eq.s32.totalorder %s2686_s19, 0 }
  0xd1   : > { %2546 = dma.done.wait (%p3243_p7), [#allocation6], 1024   ;;  %p3244_p9 = pmov %p3243_p7 }
  0xd2   : > { %p3245_p0 = pmov %p3243_p7 }
  0xd3   : > { %2548 = vsyncadd (%p3244_p9), [#allocation6], 4294966272 }
  0xd4   : > { %2550 = dma.done.wait (%p3245_p0), [#allocation9], 2048   ;;  %p3246_p2 = pmov %p3245_p0 }
  0xd5   : > { %p3247_p13 = pmov %p3245_p0 }
  0xd6   : > { %2552 = vsyncadd (%p3246_p2), [#allocation9], 4294965248 }
  0xd7   : > { %2554 = dma.done.wait (%p3247_p13), [#allocation12], 1024   ;;  %p3248_p4 = pmov %p3245_p0 }
  0xd8   : > { %v2593_v0 = vmov 0.0   ;;  %vm2594_vm0 = vmmov 0   ;;  %v2246_v1 = vld [vmem:[#allocation8] sm:$0xff]   ;;  %v2247_v2 = vld [vmem:[#allocation8 + $0x8] sm:$0xff]   ;;  %v2248_v3 = vld [vmem:[#allocation8 + $0x10] sm:$0xff]   ;;  %v521_v20 = vlaneseq  ;;  %vm875_vm1 = vcmask 261120  }
  0xd9   : > { %2556 = vsyncadd (%p3248_p4), [#allocation12], 4294966272  ;;  %1974 = vmatprep.subr.bf16.mxu0 %v2593_v0  ;;  %1990 = vmatprep.mubr.msk.bf16.mxu0 %vm2594_vm0, %v2593_v0  ;;  %v2250_v4 = vld [vmem:[#allocation7] sm:$0xff]   ;;  %v2252_v5 = vld [vmem:[#allocation7 + $0x8] sm:$0xff]   ;;  %s2595_s25 = smov 96   ;;  %s3249_s30 = sld [smem:[#allocation27_spill]] }
  0xda   : > { %1994 = vmatprep.subr.bf16.mxu1 %v2246_v1  ;;  %1975 = vmatpush3.bf16.msra.mxu0 %v2250_v4  ;;  %v2249_v6 = vld [vmem:[#allocation8 + $0x18] sm:$0xff]   ;;  %v2254_v7 = vld [vmem:[#allocation7 + $0x10] sm:$0xff]   ;;  %v2251_v8 = vld [vmem:[#allocation8 + $0x20] sm:$0xff]   ;;  %v522_v21 = vshrl.u32 %v521_v20, 7  ;;  %s2596_s2 = smov 64   ;;  %s2597_s22 = smov 32  }
  0xdb   : > { %1995 = vmatpush3.bf16.msra.mxu1 %v2246_v1  ;;  %1976 = vmatprep.subr.bf16.mxu0 %v2593_v0  ;;  %v2259_v9 = vld [vmem:[%s2951_s12] sm:$0xff]   ;;  %v2256_v10 = vld [vmem:[#allocation7 + $0x18] sm:$0xff]   ;;  %v2253_v11 = vld [vmem:[#allocation8 + $0x28] sm:$0xff]   ;;  %s3250_s26 = sld [smem:[#allocation21_spill]]  ;;  %s493_s4 = scalar_lea.vmem [#allocation13], %s1838_s11 }
  0xdc   : > { %1996 = vmatprep.subr.bf16.mxu1 %v2247_v2  ;;  %2010 = vmatprep.mubr.bf16.mxu1 %v2259_v9  ;;  %v2258_v12 = vld [vmem:[#allocation7 + $0x20] sm:$0xff]   ;;  %v2255_v13 = vld [vmem:[#allocation8 + $0x30] sm:$0xff]   ;;  %v2261_v14 = vld [vmem:[#allocation7 + $0x28] sm:$0xff]   ;;  %v2994_v24 = vsub.s32 0, %v522_v21  ;;  %s1675_s23 = sshll.u32 %s493_s4, 4  ;;  %s3252_s21 = sld [smem:[#allocation29_spill]]  ;;  %s3147_s23 = int_to_ptr.vmem [resolvable:$true] %s1675_s23 }
  0xdd   : > { %v2257_v15 = vld [vmem:[#allocation8 + $0x38] sm:$0xff]   ;;  %v2262_v16 = vld [vmem:[#allocation7 + $0x30] sm:$0xff]   ;;  %v2265_v48 = vld [vmem:[#allocation10] sm:$0xff]   ;;  %s1660_s24 = scalar_lea.sflag [#allocation4], %s2937_s6  ;;  %s2598_s11 = smov [#allocation13]  }
  0xde   : > { %1977 = vmatpush3.bf16.msra.mxu0 %v2252_v5  ;;  %v2980_v17 = vld [vmem:[%s2951_s12 + $0x8] sm:$0xff]   ;;  %v636_v22 = vld [vmem:[%s3203_s5] sm:$0x1]  ;;  %v2269_v52 = vld [vmem:[#allocation10 + $0x20] sm:$0xff]   ;;  %s2489_s28 = sshll.u32 %s2598_s11, 4  ;;  %s2490_s28 = int_to_ptr.vmem [resolvable:$false] %s2489_s28 }
  0xdf   : > { %1997 = vmatpush3.bf16.msra.mxu1 %v2247_v2  ;;  %1978 = vmatprep.subr.bf16.mxu0 %v2593_v0  ;;  %v2263_v18 = vld [vmem:[#allocation7 + $0x38] sm:$0xff]   ;;  %v519_v23 = vld [vmem:[%s3201_s3] sm:$0x1]  ;;  %v637_v25 = vunpack.c.l.bf16 %v636_v22  ;;  %v2266_v49 = vld [vmem:[#allocation10 + $0x8] sm:$0xff]   ;;  %s2491_s16 = scalar_lea.vmem %s2490_s28, 256  ;;  %p2492_p3 = scmp.lt.s32.totalorder %s3147_s23, %s2490_s28 }
  0xe0   : > { %1998 = vmatprep.subr.bf16.mxu1 %v2248_v3  ;;  %v2264_v19 = vld [vmem:[%s2943_s7] sm:$0xff]   ;;  %v520_v26 = vunpack.c.l.bf16 %v519_v23  ;;  %v2270_v53 = vld [vmem:[#allocation10 + $0x28] sm:$0xff]   ;;  %s3251_s7 = sld [smem:[#allocation28_spill]] }
  0xe1   : > { %v641_v27 = vrot.slane %v637_v25, %v2994_v24  ;;  %v2267_v50 = vld [vmem:[#allocation10 + $0x10] sm:$0xff]   ;;  %v2268_v51 = vld [vmem:[#allocation10 + $0x18] sm:$0xff]   ;;  %s1903_s0 = sshll.u32 %s3250_s26, 7 }
  0xe2   : > { %1979 = vmatpush3.bf16.msra.mxu0 %v2254_v7  ;;  %v524_v29 = vrot.slane %v520_v26, %v2994_v24  ;;  %v2271_v54 = vld [vmem:[#allocation10 + $0x30] sm:$0xff]   ;;  %v2272_v55 = vld [vmem:[#allocation10 + $0x38] sm:$0xff]   ;;  %s3145_s29 = scalar_lea.hbm %s3252_s21, %s1903_s0 }
  0xe3   : > { %1999 = vmatpush3.bf16.msra.mxu1 %v2248_v3  ;;  %1980 = vmatprep.subr.bf16.mxu0 %v2593_v0  ;;  %v767_v1 = vld [vmem:[%s3249_s30] sm:$0x1] }
  0xe4   : > { %2000 = vmatprep.subr.bf16.mxu1 %v2249_v6  ;;  %v768_v2 = vunpack.c.l.bf16 %v767_v1 }
  0xe6   : > { %1981 = vmatpush3.bf16.msra.mxu0 %v2256_v10  ;;  %v772_v4 = vrot.slane %v768_v2, %v2994_v24 }
  0xe7   : > { %2001 = vmatpush3.bf16.msra.mxu1 %v2249_v6  ;;  %1982 = vmatprep.subr.bf16.mxu0 %v2593_v0 }
  0xe8   : > { %2002 = vmatprep.subr.bf16.mxu1 %v2251_v8 }
  0xea   : > { %1983 = vmatpush3.bf16.msra.mxu0 %v2258_v12 }
  0xeb   : > { %2003 = vmatpush3.bf16.msra.mxu1 %v2251_v8  ;;  %1984 = vmatprep.subr.bf16.mxu0 %v2593_v0 }
  0xec   : > { %2004 = vmatprep.subr.bf16.mxu1 %v2253_v11 }
  0xee   : > { %1985 = vmatpush3.bf16.msra.mxu0 %v2261_v14 }
  0xef   : > { %2005 = vmatpush3.bf16.msra.mxu1 %v2253_v11  ;;  %1986 = vmatprep.subr.bf16.mxu0 %v2593_v0 }
  0xf0   : > { %2006 = vmatprep.subr.bf16.mxu1 %v2255_v13 }
  0xf2   : > { %1987 = vmatpush3.bf16.msra.mxu0 %v2262_v16 }
  0xf3   : > { %2007 = vmatpush3.bf16.msra.mxu1 %v2255_v13  ;;  %1988 = vmatprep.subr.bf16.mxu0 %v2593_v0 }
  0xf4   : > { %2008 = vmatprep.subr.bf16.mxu1 %v2257_v15 }
  0xf6   : > { %1989 = vmatpush3.bf16.msra.mxu0 %v2263_v18 }
  0xf7   : > { %2009 = vmatpush3.bf16.msra.mxu1 %v2257_v15  ;;  %2014 = vmatprep.subr.bf16.mxu0 %v2265_v48 }
  0xf8   : > { %2034 = vmatprep.subr.bf16.mxu1 %v2593_v0 }
  0xf9   : > { %1991 = vmatmul.mubr.bf16.vlgmr.msra.gmra.mrb[0].mxu0 %v2264_v19 }
  0xfa   : > { %2011 = vmatmul.mubr.bf16.vlgmr.msra.gmra.mrb[0].mxu1 %v2980_v17  ;;  %2030 = vmatprep.mubr.bf16.mxu0 %v2259_v9 }
  0xfb   : > { %2038 = vmatprep.mubr.msk.bf16.mxu1 %vm2594_vm0, %v2593_v0  ;;  %2015 = vmatpush3.bf16.msra.mxu0 %v2265_v48 }
  0xfc   : > { %2016 = vmatprep.subr.bf16.mxu0 %v2266_v49 }
  0xff   : > { %2017 = vmatpush3.bf16.msra.mxu0 %v2266_v49 }
 0x100   : > { %2018 = vmatprep.subr.bf16.mxu0 %v2267_v50 }
 0x103   : > { %2019 = vmatpush3.bf16.msra.mxu0 %v2267_v50 }
 0x104   : > { %2020 = vmatprep.subr.bf16.mxu0 %v2268_v51 }
 0x107   : > { %2021 = vmatpush3.bf16.msra.mxu0 %v2268_v51 }
 0x108   : > { %2022 = vmatprep.subr.bf16.mxu0 %v2269_v52 }
 0x10b   : > { %2023 = vmatpush3.bf16.msra.mxu0 %v2269_v52 }
 0x10c   : > { %2024 = vmatprep.subr.bf16.mxu0 %v2270_v53 }
 0x10f   : > { %2025 = vmatpush3.bf16.msra.mxu0 %v2270_v53 }
 0x110   : > { %2026 = vmatprep.subr.bf16.mxu0 %v2271_v54 }
 0x113   : > { %2027 = vmatpush3.bf16.msra.mxu0 %v2271_v54 }
 0x114   : > { %2028 = vmatprep.subr.bf16.mxu0 %v2272_v55 }
 0x117   : > { %2029 = vmatpush3.bf16.msra.mxu0 %v2272_v55 }
 0x118   : > { %2058 = vmatprep.subr.bf16.mxu0 %v2593_v0 }
 0x11a   : > { %2031 = vmatmul.mubr.bf16.vlgmr.msra.gmra.mrb[4].mxu0 %v2980_v17 }
 0x11b   : > { %2062 = vmatprep.mubr.msk.bf16.mxu0 %vm2594_vm0, %v2593_v0 }
 0x1cc   : > { %v613_v35 = vpop.f32.mrb[0].mxu0 }
 0x1cd   : > { %v2012_v28 = vpop.f32.mrb[0].mxu1  ;;  %v614_v38 = vadd.f32 %v613_v35, %v524_v29  ;;  %v1992_v39 = vpop.f32.mrb[1].mxu0 }
 0x1ce   : > { %v736_v30 = vpop.f32.mrb[1].mxu1  ;;  %v745_v32 = vadd.f32 %v2012_v28, %v641_v27  ;;  %v616_v41 = vpop.f32.mrb[2].mxu0 }
 0x1cf   : > { %v2013_v31 = vpop.f32.mrb[2].mxu1  ;;  %v737_v36 = vadd.f32 %v736_v30, %v641_v27  ;;  %v617_v43 = vadd.f32 %v616_v41, %v524_v29  ;;  %v1993_v44 = vpop.f32.mrb[3].mxu0 }
 0x1d0   : > { %v748_v33 = vadd.f32 %v2013_v31, %v641_v27  ;;  %v739_v34 = vpop.f32.mrb[3].mxu1 }
 0x1d1   : > { %v740_v37 = vadd.f32 %v739_v34, %v641_v27  ;;  %v3004_v46 = vpack.c.bf16 %v617_v43, %v614_v38  ;;  %v2274_v38 = vld [vmem:[#allocation11 + $0x8] sm:$0xff]  }
 0x1d2   : > { %v2998_v40 = vpack.c.bf16 %v748_v33, %v745_v32 }
 0x1d3   : > { %v3000_v42 = vpack.c.bf16 %v740_v37, %v737_v36  ;;  %v2273_v36 = vld [vmem:[#allocation11] sm:$0xff]  }
 0x1d4   : > { %v883_v47 = vsel %vm875_vm1, %v2998_v40, 0 }
 0x1d5   : > { %v880_v45 = vsel %vm875_vm1, %v3000_v42, 0 }
 0x1d6   : > { %2035 = vmatpush3.bf16.xpose.msra.mxu1 %v880_v45 }
 0x1d7   : > { %2036 = vmatprep.subr.bf16.mxu1 %v2593_v0 }
 0x1de   : > { %2037 = vmatpush3.bf16.xpose.msra.mxu1 %v883_v47 }
 0x1df   : > { %2042 = vmatprep.subr.bf16.mxu1 %v2593_v0 }
 0x1e5   : > { %2039 = vmatmul.mubr.msk.bf16.vlgmr.msra.gmra.mrb[4].mxu1 %vm875_vm1, %v3004_v46 }
 0x1e6   : > { %2046 = vmatprep.mubr.msk.bf16.mxu1 %vm2594_vm0, %v2593_v0 }
 0x1ed   : > { %v2032_v6 = vpop.f32.mrb[4].mxu0 }
 0x1ee   : > { %v864_v8 = vadd.f32 %v2032_v6, %v772_v4  ;;  %v855_v9 = vpop.f32.mrb[5].mxu0 }
 0x1ef   : > { %v856_v11 = vadd.f32 %v855_v9, %v772_v4  ;;  %v2033_v12 = vpop.f32.mrb[6].mxu0 }
 0x1f0   : > { %v867_v14 = vadd.f32 %v2033_v12, %v772_v4  ;;  %v858_v15 = vpop.f32.mrb[7].mxu0 }
 0x1f1   : > { %v859_v16 = vadd.f32 %v858_v15, %v772_v4 }
 0x1f2   : > { %v3026_v18 = vpack.c.bf16 %v867_v14, %v864_v8 }
 0x1f3   : > { %v3028_v19 = vpack.c.bf16 %v859_v16, %v856_v11 }
 0x1f5   : > { %2043 = vmatpush3.bf16.msra.mxu1 %v3028_v19 }
 0x1f6   : > { %2044 = vmatprep.subr.bf16.mxu1 %v2593_v0 }
 0x1f9   : > { %2045 = vmatpush3.bf16.msra.mxu1 %v3026_v18 }
 0x1fa   : > { %2050 = vmatprep.subr.bf16.mxu1 %v2593_v0 }
 0x2b8   : > { %v919_v56 = vpop.f32.mrb[4].mxu1 }
 0x2b9   : > { %v926_v57 = vmul.f32 0.17677669, %v919_v56  ;;  %v2040_v58 = vpop.f32.mrb[5].mxu1 }
 0x2ba   : > { %v922_v59 = vpop.f32.mrb[6].mxu1 }
 0x2bb   : > { %v927_v60 = vmul.f32 0.17677669, %v922_v59  ;;  %v2041_v61 = vpop.f32.mrb[7].mxu1  ;;  %v928_v62 = vsel %vm875_vm1, %v926_v57, -inf }
 0x2bc   : > { %929 = vmax.xlane.f32.xlu0 %v928_v62 }
 0x2bd   : > { %v931_v63 = vsel %vm875_vm1, %v927_v60, -inf }
 0x2c0   : > { %932 = vmax.xlane.f32.xlu0 %v931_v63 }
 0x2d6   : > { %1005 = vrot.lane.b32.xlu0 %v3000_v42, %s2595_s25 }
 0x349   : > { %v930_v3 = vpop.xlane.xlu0 %929 }
 0x34a   : > { %v934_v5 = vsub.f32 %v926_v57, %v930_v3 }
 0x34c   : > { %v936_v7 = vmul.f32 1.442695, %v934_v5 }
 0x34d   : > { %v933_v10 = vpop.xlane.xlu0 %932 }
 0x34e   : > { %2281 = vpow2.f32 %v936_v7  ;;  %v935_v13 = vsub.f32 %v927_v60, %v933_v10 }
 0x350   : > { %v938_v17 = vmul.f32 1.442695, %v935_v13 }
 0x351   : > { %v1006_v31 = vpop.permute.xlu0 %1005 }
 0x352   : > { %2283 = vpow2.f32 %v938_v17  ;;  %v1013_v33 = vsel %vm875_vm1, %v1006_v31, 0 }
 0x358   : > { %v2282_v20 = vpop.eup %2281 }
 0x359   : > { %v940_v21 = vsel %vm875_vm1, %v2282_v20, 0.0 }
 0x35a   : > { %941 = vadd.xlane.f32.xlu1 %v940_v21 }
 0x35c   : > { %v2284_v22 = vpop.eup %2283 }
 0x35d   : > { %v943_v23 = vsel %vm875_vm1, %v2284_v22, 0.0 }
 0x35e   : > { %944 = vadd.xlane.f32.xlu1 %v943_v23 }
 0x36f   : > { %1007 = vrot.lane.b32.xlu1 %v2998_v40, %s2595_s25 }
 0x373   : > { %1001 = vrot.lane.b32.xlu1 %v3004_v46, %s2595_s25 }
 0x3e7   : > { %v942_v25 = vpop.xlane.xlu1 %941 }
 0x3e8   : > { %2285 = vrcp.f32 %v942_v25 }
 0x3eb   : > { %v945_v26 = vpop.xlane.xlu1 %944 }
 0x3ec   : > { %2287 = vrcp.f32 %v945_v26 }
 0x3ef   : > { %v1008_v34 = vpop.permute.xlu1 %1007 }
 0x3f0   : > { %v1016_v35 = vsel %vm875_vm1, %v1008_v34, 0 }
 0x3f2   : > { %v2286_v27 = vpop.eup %2285 }
 0x3f3   : > { %v947_v29 = vmul.f32 %v2286_v27, %v2282_v20  ;;  %v1002_v37 = vpop.permute.xlu1 %1001 }
 0x3f6   : > { %v2288_v28 = vpop.eup %2287 }
 0x3f7   : > { %v949_v30 = vmul.f32 %v2288_v28, %v2284_v22 }
 0x3f9   : > { %v950_v32 = vpack.c.bf16 %v949_v30, %v947_v29 }
 0x3fb   : > { %2047 = vmatmul.mubr.msk.bf16.vlgmr.msra.gmra.mrb[8].mxu1 %vm875_vm1, %v950_v32 }
 0x3fc   : > { %2051 = vmatpush3.bf16.xpose.msra.mxu1 %v1013_v33  ;;  %2054 = vmatprep.mubr.msk.bf16.mxu1 %vm2594_vm0, %v2593_v0 }
 0x3fd   : > { %2052 = vmatprep.subr.bf16.mxu1 %v2593_v0 }
 0x404   : > { %2053 = vmatpush3.bf16.xpose.msra.mxu1 %v1016_v35 }
 0x405   : > { %2074 = vmatprep.subr.bf16.mxu1 %v2593_v0 }
 0x40b   : > { %2055 = vmatmul.mubr.msk.bf16.vlgmr.msra.gmra.mrb[12].mxu1 %vm875_vm1, %v1002_v37 }
 0x40c   : > { %2075 = vmatpush3.bf16.msra.mxu1 %v2273_v36  ;;  %2078 = vmatprep.mubr.msk.bf16.mxu1 %vm2594_vm0, %v2593_v0 }
 0x40d   : > { %2076 = vmatprep.subr.bf16.mxu1 %v2593_v0 }
 0x410   : > { %2077 = vmatpush3.bf16.msra.mxu1 %v2274_v38 }
 0x411   : > { %2090 = vmatprep.subr.bf16.mxu1 %v2593_v0 }
 0x4ce   : > { %v988_v39 = vpop.f32.mrb[8].mxu1 }
 0x4cf   : > { %v2048_v41 = vpop.f32.mrb[9].mxu1 }
 0x4d0   : > { %v991_v43 = vpop.f32.mrb[10].mxu1 }
 0x4d1   : > { %v995_v44 = vpack.c.bf16 %v991_v43, %v988_v39  ;;  %v2049_v45 = vpop.f32.mrb[11].mxu1 }
 0x4d3   : > { %2079 = vmatmul.mubr.msk.bf16.vlgmr.msra.gmra.mrb[16].mxu1 %vm875_vm1, %v995_v44 }
 0x4d4   : > { %2094 = vmatprep.mubr.msk.bf16.mxu1 %vm2594_vm0, %v2593_v0 }
 0x4de   : > { %v1052_v47 = vpop.f32.mrb[12].mxu1 }
 0x4df   : > { %v1059_v48 = vmul.f32 0.17677669, %v1052_v47  ;;  %v2056_v49 = vpop.f32.mrb[13].mxu1 }
 0x4e0   : > { %v1055_v50 = vpop.f32.mrb[14].mxu1 }
 0x4e1   : > { %v1060_v51 = vmul.f32 0.17677669, %v1055_v50  ;;  %v2057_v52 = vpop.f32.mrb[15].mxu1  ;;  %v1061_v53 = vsel %vm875_vm1, %v1059_v48, -inf }
 0x4e2   : > { %1062 = vmax.xlane.f32.xlu1 %v1061_v53 }
 0x4e3   : > { %v1064_v54 = vsel %vm875_vm1, %v1060_v51, -inf }
 0x4e4   : > { %1065 = vmax.xlane.f32.xlu0 %v1064_v54 }
 0x4f3   : > { %1086 = vrot.lane.b32.xlu1 %v3028_v19, %s2595_s25 }
 0x4f7   : > { %1255 = vrot.lane.b32.xlu1 %v3000_v42, %s2596_s2 }
 0x4fb   : > { %1257 = vrot.lane.b32.xlu1 %v2998_v40, %s2596_s2 }
 0x4ff   : > { %1253 = vrot.lane.b32.xlu1 %v3004_v46, %s2596_s2 }
 0x503   : > { %1451 = vrot.lane.b32.xlu1 %v2998_v40, %s2597_s22 }
 0x56f   : > { %v1063_v55 = vpop.xlane.xlu1 %1062 }
 0x570   : > { %v1067_v56 = vsub.f32 %v1059_v48, %v1063_v55 }
 0x571   : > { %v1066_v57 = vpop.xlane.xlu0 %1065 }
 0x572   : > { %v1069_v58 = vmul.f32 1.442695, %v1067_v56  ;;  %v1068_v59 = vsub.f32 %v1060_v51, %v1066_v57 }
 0x573   : > { %v1087_v60 = vpop.permute.xlu1 %1086 }
 0x574   : > { %2289 = vpow2.f32 %v1069_v58  ;;  %v1071_v61 = vmul.f32 1.442695, %v1068_v59  ;;  %2059 = vmatpush3.bf16.msra.mxu0 %v1087_v60 }
 0x575   : > { %2060 = vmatprep.subr.bf16.mxu0 %v2593_v0 }
 0x576   : > { %2291 = vpow2.f32 %v1071_v61 }
 0x577   : > { %v1256_v16 = vpop.permute.xlu1 %1255 }
 0x578   : > { %v1263_v22 = vsel %vm875_vm1, %v1256_v16, 0 }
 0x57b   : > { %v1258_v23 = vpop.permute.xlu1 %1257 }
 0x57c   : > { %v1266_v25 = vsel %vm875_vm1, %v1258_v23, 0 }
 0x57e   : > { %v2290_v62 = vpop.eup %2289 }
 0x57f   : > { %v1073_v63 = vsel %vm875_vm1, %v2290_v62, 0.0  ;;  %v1254_v27 = vpop.permute.xlu1 %1253 }
 0x580   : > { %v2292_v1 = vpop.eup %2291  ;;  %1074 = vadd.xlane.f32.xlu0 %v1073_v63 }
 0x581   : > { %v1076_v2 = vsel %vm875_vm1, %v2292_v1, 0.0 }
 0x583   : > { %v1452_v29 = vpop.permute.xlu1 %1451 }
 0x584   : > { %1077 = vadd.xlane.f32.xlu0 %v1076_v2  ;;  %v1460_v30 = vsel %vm875_vm1, %v1452_v29, 0 }
 0x59a   : > { %1088 = vrot.lane.b32.xlu0 %v3026_v18, %s2595_s25  ;;  %s2485_s25 = scalar_lea.vmem %s3147_s23, 128 }
 0x59b   : > { %p2486_p1 = scmp.ne.s32.totalorder %s3147_s23, %s2485_s25  ;;  %p2493_p11 = scmp.lt.s32.totalorder %s2491_s16, %s2485_s25 }
 0x59d   : > { %p2487_p8 = pnand %p2486_p1, %p2835_p5  ;;  %p2494_p12 = por %p2493_p11, %p2492_p3 }
 0x59e   : > { %1449 = vrot.lane.b32.xlu0 %v3000_v42, %s2597_s22  ;;  %v2275_v42 = vld [vmem:[#allocation11 + $0x10] sm:$0xff]  }
 0x59f   : > { %p2488_p10 = pneg %p2487_p8 }
 0x5a1   : > { %p2495_p6 = pnand %p2494_p12, %p2488_p10 }
 0x5a2   : > { %1447 = vrot.lane.b32.xlu0 %v3004_v46, %s2597_s22  ;;  %v2276_v46 = vld [vmem:[#allocation11 + $0x18] sm:$0xff]  }
 0x5a6   : > { %v1246_v40 = vpop.f32.mrb[16].mxu1 }
 0x5a7   : > { %v2080_v3 = vpop.f32.mrb[17].mxu1 }
 0x5a8   : > { %v1249_v4 = vpop.f32.mrb[18].mxu1 }
 0x5a9   : > { %v2081_v5 = vpop.f32.mrb[19].mxu1 }
 0x60d   : > { %v1075_v6 = vpop.xlane.xlu0 %1074 }
 0x60e   : > { %2293 = vrcp.f32 %v1075_v6 }
 0x611   : > { %v1078_v7 = vpop.xlane.xlu0 %1077 }
 0x612   : > { %2295 = vrcp.f32 %v1078_v7 }
 0x615   : > { %v1089_v8 = vpop.permute.xlu0 %1088 }
 0x616   : > { %2061 = vmatpush3.bf16.msra.mxu0 %v1089_v8 }
 0x617   : > { %2066 = vmatprep.subr.bf16.mxu0 %v2593_v0 }
 0x618   : > { %v2294_v9 = vpop.eup %2293 }
 0x619   : > { %v1080_v11 = vmul.f32 %v2294_v9, %v2290_v62  ;;  %v1450_v26 = vpop.permute.xlu0 %1449 }
 0x61a   : > { %v1457_v28 = vsel %vm875_vm1, %v1450_v26, 0 }
 0x61c   : > { %v2296_v10 = vpop.eup %2295 }
 0x61d   : > { %v1082_v12 = vmul.f32 %v2296_v10, %v2292_v1  ;;  %v1448_v31 = vpop.permute.xlu0 %1447 }
 0x61f   : > { %v1083_v13 = vpack.c.bf16 %v1082_v12, %v1080_v11 }
 0x621   : > { %2063 = vmatmul.mubr.msk.bf16.vlgmr.msra.gmra.mrb[8].mxu0 %vm875_vm1, %v1083_v13 }
 0x622   : > { %2067 = vmatpush3.bf16.msra.mxu0 %v2275_v42  ;;  %2070 = vmatprep.mubr.msk.bf16.mxu0 %vm2594_vm0, %v2593_v0 }
 0x623   : > { %2068 = vmatprep.subr.bf16.mxu0 %v2593_v0 }
 0x626   : > { %2069 = vmatpush3.bf16.msra.mxu0 %v2276_v46 }
 0x627   : > { %2082 = vmatprep.subr.bf16.mxu0 %v2593_v0 }
 0x6f4   : > { %v1129_v14 = vpop.f32.mrb[8].mxu0 }
 0x6f5   : > { %v2064_v15 = vpop.f32.mrb[9].mxu0 }
 0x6f6   : > { %v1132_v17 = vpop.f32.mrb[10].mxu0 }
 0x6f7   : > { %v1136_v20 = vpack.c.bf16 %v1132_v17, %v1129_v14  ;;  %v2065_v21 = vpop.f32.mrb[11].mxu0 }
 0x6f8   : > { %v2277_v21 = vld [vmem:[#allocation11 + $0x20] sm:$0xff]  }
 0x6f9   : > { %2071 = vmatmul.mubr.msk.bf16.vlgmr.msra.gmra.mrb[12].mxu0 %vm875_vm1, %v1136_v20 }
 0x6fa   : > { %2083 = vmatpush3.bf16.xpose.msra.mxu0 %v1263_v22  ;;  %2086 = vmatprep.mubr.msk.bf16.mxu0 %vm2594_vm0, %v2593_v0  ;;  %v2278_v22 = vld [vmem:[#allocation11 + $0x28] sm:$0xff]  }
 0x6fb   : > { %2084 = vmatprep.subr.bf16.mxu0 %v2593_v0 }
 0x702   : > { %2085 = vmatpush3.bf16.xpose.msra.mxu0 %v1266_v25 }
 0x703   : > { %2106 = vmatprep.subr.bf16.mxu0 %v2593_v0 }
 0x709   : > { %2087 = vmatmul.mubr.msk.bf16.vlgmr.msra.gmra.mrb[16].mxu0 %vm875_vm1, %v1254_v27 }
 0x70a   : > { %2107 = vmatpush3.bf16.xpose.msra.mxu0 %v1457_v28  ;;  %2110 = vmatprep.mubr.msk.bf16.mxu0 %vm2594_vm0, %v2593_v0 }
 0x70b   : > { %2108 = vmatprep.subr.bf16.mxu0 %v2593_v0 }
 0x712   : > { %2109 = vmatpush3.bf16.xpose.msra.mxu0 %v1460_v30 }
 0x719   : > { %2111 = vmatmul.mubr.msk.bf16.vlgmr.msra.gmra.mrb[20].mxu0 %vm875_vm1, %v1448_v31 }
 0x7cc   : > { %v1190_v32 = vpop.f32.mrb[12].mxu0 }
 0x7cd   : > { %v3096_v33 = vadd.f32 %v1246_v40, %v1190_v32  ;;  %v2072_v34 = vpop.f32.mrb[13].mxu0 }
 0x7ce   : > { %v1193_v35 = vpop.f32.mrb[14].mxu0 }
 0x7cf   : > { %v3098_v36 = vadd.f32 %v1249_v4, %v1193_v35  ;;  %v2073_v37 = vpop.f32.mrb[15].mxu0 }
 0x7dc   : > { %v1302_v38 = vpop.f32.mrb[16].mxu0 }
 0x7dd   : > { %v1309_v39 = vmul.f32 0.17677669, %v1302_v38  ;;  %v2088_v41 = vpop.f32.mrb[17].mxu0 }
 0x7de   : > { %v1305_v43 = vpop.f32.mrb[18].mxu0  ;;  %v2280_v41 = vld [vmem:[#allocation11 + $0x38] sm:$0xff]  }
 0x7df   : > { %v1310_v44 = vmul.f32 0.17677669, %v1305_v43  ;;  %v2089_v45 = vpop.f32.mrb[19].mxu0  ;;  %v1311_v47 = vsel %vm875_vm1, %v1309_v39, -inf }
 0x7e0   : > { %1312 = vmax.xlane.f32.xlu1 %v1311_v47 }
 0x7e1   : > { %v1314_v48 = vsel %vm875_vm1, %v1310_v44, -inf }
 0x7e2   : > { %1315 = vmax.xlane.f32.xlu0 %v1314_v48 }
 0x7ec   : > { %v1496_v49 = vpop.f32.mrb[20].mxu0 }
 0x7ed   : > { %v2112_v50 = vpop.f32.mrb[21].mxu0  ;;  %v1503_v53 = vmul.f32 0.17677669, %v1496_v49 }
 0x7ee   : > { %v1499_v51 = vpop.f32.mrb[22].mxu0 }
 0x7ef   : > { %v2113_v52 = vpop.f32.mrb[23].mxu0  ;;  %v1505_v54 = vsel %vm875_vm1, %v1503_v53, -inf  ;;  %v1504_v6 = vmul.f32 0.17677669, %v1499_v51 }
 0x7f1   : > { %1334 = vrot.lane.b32.xlu1 %v3028_v19, %s2596_s2  ;;  %v1508_v8 = vsel %vm875_vm1, %v1504_v6, -inf }
 0x815   : > { %1506 = vmax.xlane.f32.xlu1 %v1505_v54 }
 0x86d   : > { %v1313_v55 = vpop.xlane.xlu1 %1312 }
 0x86e   : > { %v1317_v56 = vsub.f32 %v1309_v39, %v1313_v55  ;;  %v2279_v39 = vld [vmem:[#allocation11 + $0x30] sm:$0xff]  }
 0x86f   : > { %v1316_v57 = vpop.xlane.xlu0 %1315 }
 0x870   : > { %v1319_v58 = vmul.f32 1.442695, %v1317_v56  ;;  %v1318_v59 = vsub.f32 %v1310_v44, %v1316_v57 }
 0x871   : > { %v1335_v60 = vpop.permute.xlu1 %1334 }
 0x872   : > { %2297 = vpow2.f32 %v1319_v58  ;;  %v1321_v61 = vmul.f32 1.442695, %v1318_v59  ;;  %2091 = vmatpush3.bf16.msra.mxu1 %v1335_v60 }
 0x873   : > { %2092 = vmatprep.subr.bf16.mxu1 %v2593_v0 }
 0x874   : > { %2299 = vpow2.f32 %v1321_v61 }
 0x87c   : > { %v2298_v62 = vpop.eup %2297 }
 0x87d   : > { %v1323_v63 = vsel %vm875_vm1, %v2298_v62, 0.0 }
 0x87e   : > { %v2300_v1 = vpop.eup %2299  ;;  %1324 = vadd.xlane.f32.xlu0 %v1323_v63 }
 0x87f   : > { %v1326_v2 = vsel %vm875_vm1, %v2300_v1, 0.0 }
 0x882   : > { %1327 = vadd.xlane.f32.xlu0 %v1326_v2 }
 0x898   : > { %1336 = vrot.lane.b32.xlu0 %v3026_v18, %s2596_s2 }
 0x8a2   : > { %v1507_v40 = vpop.xlane.xlu1 %1506 }
 0x8a3   : > { %v1511_v3 = vsub.f32 %v1503_v53, %v1507_v40 }
 0x8a5   : > { %v1513_v4 = vmul.f32 1.442695, %v1511_v3 }
 0x8a7   : > { %2301 = vpow2.f32 %v1513_v4 }
 0x8b1   : > { %v2302_v5 = vpop.eup %2301 }
 0x8b2   : > { %v1517_v7 = vsel %vm875_vm1, %v2302_v5, 0.0 }
 0x8b3   : > { %1518 = vadd.xlane.f32.xlu1 %v1517_v7 }
 0x8b7   : > { %1509 = vmax.xlane.f32.xlu0 %v1508_v8 }
 0x8c4   : > { %1528 = vrot.lane.b32.xlu1 %v3028_v19, %s2597_s22 }
 0x90b   : > { %v1325_v9 = vpop.xlane.xlu0 %1324 }
 0x90c   : > { %2303 = vrcp.f32 %v1325_v9 }
 0x90f   : > { %v1328_v10 = vpop.xlane.xlu0 %1327 }
 0x910   : > { %2305 = vrcp.f32 %v1328_v10 }
 0x913   : > { %v1337_v11 = vpop.permute.xlu0 %1336 }
 0x914   : > { %2093 = vmatpush3.bf16.msra.mxu1 %v1337_v11 }
 0x915   : > { %2098 = vmatprep.subr.bf16.mxu1 %v2593_v0 }
 0x916   : > { %v2304_v12 = vpop.eup %2303 }
 0x917   : > { %v1330_v13 = vmul.f32 %v2304_v12, %v2298_v62 }
 0x91a   : > { %v2306_v42 = vpop.eup %2305 }
 0x91b   : > { %v1332_v46 = vmul.f32 %v2306_v42, %v2300_v1 }
 0x91d   : > { %v1333_v14 = vpack.c.bf16 %v1332_v46, %v1330_v13 }
 0x91f   : > { %2095 = vmatmul.mubr.msk.bf16.vlgmr.msra.gmra.mrb[20].mxu1 %vm875_vm1, %v1333_v14 }
 0x920   : > { %2102 = vmatprep.mubr.msk.bf16.mxu1 %vm2594_vm0, %v2593_v0  ;;  %2099 = vmatpush3.bf16.msra.mxu1 %v2277_v21 }
 0x921   : > { %2100 = vmatprep.subr.bf16.mxu1 %v2593_v0 }
 0x924   : > { %2101 = vmatpush3.bf16.msra.mxu1 %v2278_v22 }
 0x925   : > { %2114 = vmatprep.subr.bf16.mxu1 %v2593_v0 }
 0x940   : > { %v1519_v25 = vpop.xlane.xlu1 %1518 }
 0x944   : > { %v1510_v15 = vpop.xlane.xlu0 %1509  ;;  %v1529_v32 = vpop.permute.xlu1 %1528 }
 0x945   : > { %v1512_v19 = vsub.f32 %v1504_v6, %v1510_v15 }
 0x947   : > { %v1515_v16 = vmul.f32 1.442695, %v1512_v19 }
 0x949   : > { %2307 = vpow2.f32 %v1515_v16 }
 0x953   : > { %v2308_v17 = vpop.eup %2307 }
 0x954   : > { %v1520_v20 = vsel %vm875_vm1, %v2308_v17, 0.0 }
 0x955   : > { %1521 = vadd.xlane.f32.xlu0 %v1520_v20 }
 0x96b   : > { %1530 = vrot.lane.b32.xlu0 %v3026_v18, %s2597_s22 }
 0x9e2   : > { %v1522_v23 = vpop.xlane.xlu0 %1521 }
 0x9e3   : > { %2309 = vrcp.f32 %v1522_v23 }
 0x9e4   : > { %2311 = vrcp.f32 %v1519_v25 }
 0x9e6   : > { %v1531_v37 = vpop.permute.xlu0 %1530 }
 0x9ed   : > { %v2310_v31 = vpop.eup %2309 }
 0x9ee   : > { %v2312_v18 = vpop.eup %2311  ;;  %v1526_v34 = vmul.f32 %v2310_v31, %v2308_v17 }
 0x9ef   : > { %v1524_v35 = vmul.f32 %v2312_v18, %v2302_v5 }
 0x9f1   : > { %v1527_v38 = vpack.c.bf16 %v1526_v34, %v1524_v35 }
 0x9f2   : > { %v1377_v26 = vpop.f32.mrb[20].mxu1 }
 0x9f3   : > { %v2096_v27 = vpop.f32.mrb[21].mxu1 }
 0x9f4   : > { %v1380_v28 = vpop.f32.mrb[22].mxu1 }
 0x9f5   : > { %v1384_v29 = vpack.c.bf16 %v1380_v28, %v1377_v26  ;;  %v2097_v30 = vpop.f32.mrb[23].mxu1 }
 0x9f7   : > { %2103 = vmatmul.mubr.msk.bf16.vlgmr.msra.gmra.mrb[24].mxu1 %vm875_vm1, %v1384_v29 }
 0x9f8   : > { %2115 = vmatpush3.bf16.msra.mxu1 %v1529_v32  ;;  %2118 = vmatprep.mubr.msk.bf16.mxu1 %vm2594_vm0, %v2593_v0 }
 0x9f9   : > { %2116 = vmatprep.subr.bf16.mxu1 %v2593_v0 }
 0x9fc   : > { %2117 = vmatpush3.bf16.msra.mxu1 %v1531_v37 }
 0x9fd   : > { %2122 = vmatprep.subr.bf16.mxu1 %v2593_v0 }
 0x9ff   : > { %2119 = vmatmul.mubr.msk.bf16.vlgmr.msra.gmra.mrb[28].mxu1 %vm875_vm1, %v1527_v38 }
 0xa00   : > { %2126 = vmatprep.mubr.msk.bf16.mxu1 %vm2594_vm0, %v2593_v0  ;;  %2123 = vmatpush3.bf16.msra.mxu1 %v2279_v39 }
 0xa01   : > { %2124 = vmatprep.subr.bf16.mxu1 %v2593_v0  ;;  %v1641_v0 = vld [vmem:[%s3251_s7] sm:$0x1] }
 0xa02   : > { %v1642_v55 = vunpack.c.l.bf16 %v1641_v0 }
 0xa04   : > { %2125 = vmatpush3.bf16.msra.mxu1 %v2280_v41 }
 0xaca   : > { %v1438_v43 = vpop.f32.mrb[24].mxu1 }
 0xacb   : > { %v1445_v44 = vadd.f32 %v1438_v43, %v3096_v33  ;;  %v2104_v45 = vpop.f32.mrb[25].mxu1 }
 0xacc   : > { %v1441_v47 = vpop.f32.mrb[26].mxu1 }
 0xacd   : > { %v1446_v48 = vadd.f32 %v1441_v47, %v3098_v36  ;;  %v2105_v49 = vpop.f32.mrb[27].mxu1  ;;  %v1646_v36 = vrot.slane %v1642_v55, %v2994_v24 }
 0xad2   : > { %v1571_v50 = vpop.f32.mrb[28].mxu1 }
 0xad3   : > { %v2120_v51 = vpop.f32.mrb[29].mxu1 }
 0xad4   : > { %v1574_v52 = vpop.f32.mrb[30].mxu1 }
 0xad5   : > { %v1578_v53 = vpack.c.bf16 %v1574_v52, %v1571_v50  ;;  %v2121_v54 = vpop.f32.mrb[31].mxu1 }
 0xad7   : > { %2127 = vmatmul.mubr.msk.bf16.vlgmr.msra.gmra.mrb[32].mxu1 %vm875_vm1, %v1578_v53 }
 0xbaa   : > { %v1632_v33 = vpop.f32.mrb[32].mxu1 }
 0xbab   : > { %v1639_v56 = vadd.f32 %v1632_v33, %v1445_v44  ;;  %v2128_v57 = vpop.f32.mrb[33].mxu1 }
 0xbac   : > { %v1635_v58 = vpop.f32.mrb[34].mxu1 }
 0xbad   : > { %v1640_v59 = vadd.f32 %v1635_v58, %v1446_v48  ;;  %v2129_v60 = vpop.f32.mrb[35].mxu1  ;;  %v1647_v61 = vadd.f32 %v1646_v36, %v1639_v56 }
 0xbaf   : > { %v1648_v62 = vadd.f32 %v1646_v36, %v1640_v59 }
 0xbb1   : > { %v1907_v63 = vpack.c.bf16 %v1648_v62, %v1647_v61 }
 0xbb3   : > { %1908 = vst [vmem:[%s493_s4] sm:$0xff] %v1907_v63  }
 0xbb4   : > { %2498 = shalt.err (!%p2495_p6)
}
 0xbb5   : > { %s2499_s30 = scalar_lea.hbm %s3145_s29, 128  ;;  %s2503_s10 = scalar_lea.hbm %s3252_s21, 256 }
 0xbb6   : > { %p2500_p7 = scmp.ne.s32.totalorder %s3145_s29, %s2499_s30  ;;  %p2504_p2 = scmp.lt.u32.totalorder %s3145_s29, %s3252_s21 }
 0xbb7   : > { %p2505_p13 = scmp.lt.u32.totalorder %s2503_s10, %s2499_s30  ;;  %p2507_p1 = scmp.lt.u32.totalorder %s2499_s30, %s3145_s29 }
 0xbb8   : > { %p2501_p9 = pnand %p2500_p7, %p2835_p5 }
 0xbb9   : > { %p2506_p4 = por %p2505_p13, %p2504_p2 }
 0xbba   : > { %p2502_p0 = pneg %p2501_p9 }
 0xbbb   : > { %p2508_p8 = por %p2507_p1, %p2506_p4 }
 0xbbd   : > { %p2509_p10 = pnand %p2508_p8, %p2502_p0 }
 0xbbf   : > { %2512 = shalt.err (!%p2509_p10)
}
 0xbc0   : > { %s2599_s0 = smov 4  }
 0xbc1   : > { %2150 = dma.vmem_to_hbm [thread:$0]  (%p2835_p5), %s3147_s23, 128, %s3145_s29, %s1660_s24, %s2596_s2, %s2596_s2, %s2599_s0  }
 0xbc2 PF: > { %s3253_s4 = sld [smem:[#allocation20_spill]]  ;;  %s3254_s12 = sld [smem:[#allocation22_spill]] }
 0xbc3   : > { %p3256_p11 = scmp.ge.s32.totalorder %s2583_s18, 2 }
 0xbc8   : > { %s1690_s19 = sand.u32 1, %s3253_s4   ;;  %p3255_p3 = scmp.ne.s32.totalorder %s3254_s12, 0 }
 0xbc9   : > { %s1691_s25 = scalar_lea.sflag [#allocation4], %s1690_s19 }
 0xbca   : > { %p2173_p12 = pnand %p3256_p11, %p3255_p3 }
 0xbcc   : > { %2558 = dma.done.wait (!%p2173_p12), %s1691_s25, 128  }
 0xbcd   : > { %2560 = vsyncadd (!%p2173_p12), %s1691_s25, 4294967168  ;;  %s31_s18 = sadd.s32 1, %s2583_s18   ;;  %s3257_s9 = smov %s3264_s13 }
 0xbce   : > { %p28_p6 = scmp.ge.s32.totalorder %s31_s18, 4   ;;  %s3258_s13 = smov %s2567_s14 }
 0xbcf   : > { %s3259_s14 = smov %s2571_s15  ;;  %s3260_s15 = smov %s2847_s27 }
 0xbd0   : > { %s3261_s16 = smov %s2579_s17  ;;  %s3262_s17 = smov %s3257_s9 }
 0xbd1   :  { %30 = sbr.rel (!%p28_p6) target bundleno = 18 (0x12), region = 134 }
 0xbd8   :  { %1696 = vsyncpa [#allocation3], 1 }
 0xbd9   :  { %1698 = vsyncpa [#allocation3 + $0x1], 1 }
 0xbda   :  { %1699 = vsyncpa [#allocation6], 1 }
 0xbdb   :  { %1701 = vsyncpa [#allocation6 + $0x1], 1 }
 0xbdc   :  { %1702 = vsyncpa [#allocation9], 1 }
 0xbdd   :  { %1703 = vsyncpa [#allocation12], 1 }
 0xbde   :  { %1704 = vsyncpa [#allocation4], 1 }
 0xbdf   :  { %1706 = vsyncpa [#allocation4 + $0x1], 1 }

</bundles_post_ra>
